<compile_context>
chip_gen: v6e
topology: v6e:2x2x1
jax: 0.10.0
libtpu: 0.0.40
codegen_flags: <defaults>
</compile_context>

<pallas_src>
import functools
import math

import jax
import jax.numpy as jnp
import numpy as np
from jax import lax
from jax.experimental import pallas as pl
from jax.experimental.pallas import tpu as pltpu


def _self_attention_kernel(x_ref, wqkv_ref, bqkv_ref, wproj_ref, bproj_ref,
                           o_ref, qkv_ref, *, n_batch, n_head, head_dim, seq_len):
    # x_ref    : (BG, C, T)   feature-major input slab (NCHW order, no wrapper transpose)
    # wqkv_ref : (C, 3C)      c_attn weight, (in, out) layout
    # bqkv_ref : (1, 3C)      c_attn bias
    # wproj_ref: (C, C)       c_proj weight, (in, out) layout
    # bproj_ref: (1, C)       c_proj bias
    # o_ref    : (BG, C, T)   feature-major output slab
    # qkv_ref  : (BG*T, 3C)   VMEM scratch
    C = n_head * head_dim
    T = seq_len
    scale = 1.0 / math.sqrt(head_dim)

    # ---- feature-major -> token-major, in kernel (cheap XLU transposes,
    #      replaces standalone XLA transpose ops / HBM round trips) ----
    if n_batch == 1:
        x_tok = x_ref[0].T                                               # (T, C)
    else:
        x_tok = jnp.concatenate([x_ref[b].T for b in range(n_batch)], axis=0)  # (R, C)

    # ---- c_attn: one MXU matmul over all folded rows; park in VMEM scratch so
    #      the unrolled head loop doesn't keep the whole (R, 3C) slab in vregs ----
    qkv_ref[...] = (jnp.dot(x_tok, wqkv_ref[...],
                            preferred_element_type=jnp.float32) + bqkv_ref[...])

    # ---- per-(batch, head) attention; head outputs lane-concatenated,
    #      projection done once afterwards ----
    y_rows = []
    for b in range(n_batch):                                             # static unroll
        r0 = b * T
        heads = []
        for h in range(n_head):                                          # static unroll
            lo = h * head_dim
            # scale folded into q (T*hd elems) instead of the (T,T) scores
            qh = qkv_ref[pl.ds(r0, T), pl.ds(lo, head_dim)] * scale       # (T, hd)
            kh = qkv_ref[pl.ds(r0, T), pl.ds(C + lo, head_dim)]           # (T, hd)
            vh = qkv_ref[pl.ds(r0, T), pl.ds(2 * C + lo, head_dim)]       # (T, hd)

            # q @ k^T without materializing a transpose of kh
            s = lax.dot_general(qh, kh, (((1,), (1,)), ((), ())),
                                preferred_element_type=jnp.float32)       # (T, T)
            s = s - jnp.max(s, axis=-1, keepdims=True)                    # stable softmax
            p = jnp.exp(s)                                                # unnormalized
            yh = jnp.dot(p, vh, preferred_element_type=jnp.float32)       # (T, hd)
            # deferred normalization: (T,1) reciprocal + (T,hd) multiply
            inv = pl.reciprocal(jnp.sum(p, axis=-1, keepdims=True), approx=False)
            heads.append(yh * inv)
        y_rows.append(jnp.concatenate(heads, axis=-1))                    # (T, C)
    y = y_rows[0] if n_batch == 1 else jnp.concatenate(y_rows, axis=0)    # (R, C)

    # ---- c_proj: single (R, C) @ (C, C) matmul, full contraction depth ----
    out = (jnp.dot(y, wproj_ref[...], preferred_element_type=jnp.float32)
           + bproj_ref[...]).astype(o_ref.dtype)                          # (R, C)

    # ---- write back feature-major (C, T) per batch element ----
    for b in range(n_batch):
        o_ref[b] = out[b * T:(b + 1) * T, :].T


@functools.partial(jax.jit, static_argnames=("n_head",))
def self_attention_forward(x_nchw, w_attn, b_attn, w_proj, b_proj, n_head):
    """x_nchw: (B, C, H, W). Linear weights in (in, out) layout (PyTorch weight.T)."""
    B, C, H, W = x_nchw.shape
    T = H * W
    head_dim = C // n_head

    # >= 2 "parallel" grid steps when possible (keeps both v7x TensorCores busy);
    # batch elements within a group fold into the matmul row dimension.
    groups = 2 if (B >= 2 and B % 2 == 0) else 1
    bg = B // groups

    # pure reshapes, no copies: NCHW -> (groups, bg, C, T) feature-major slabs
    x_g = x_nchw.reshape(groups, bg, C, T)
    b_attn2 = b_attn.reshape(1, 3 * C)
    b_proj2 = b_proj.reshape(1, C)

    kernel = functools.partial(_self_attention_kernel, n_batch=bg,
                               n_head=n_head, head_dim=head_dim, seq_len=T)

    out_g = pl.pallas_call(
        kernel,
        out_shape=jax.ShapeDtypeStruct((groups, bg, C, T), x_nchw.dtype),
        grid_spec=pltpu.PrefetchScalarGridSpec(
            num_scalar_prefetch=0,
            grid=(groups,),
            in_specs=[
                pl.BlockSpec((None, bg, C, T), lambda g: (g, 0, 0, 0)),   # x (group dim squeezed)
                pl.BlockSpec((C, 3 * C), lambda g: (0, 0)),               # c_attn weight
                pl.BlockSpec((1, 3 * C), lambda g: (0, 0)),               # c_attn bias
                pl.BlockSpec((C, C), lambda g: (0, 0)),                   # c_proj weight
                pl.BlockSpec((1, C), lambda g: (0, 0)),                   # c_proj bias
            ],
            out_specs=pl.BlockSpec((None, bg, C, T), lambda g: (g, 0, 0, 0)),
            scratch_shapes=[pltpu.VMEM((bg * T, 3 * C), jnp.float32)],
        ),
        compiler_params=pltpu.CompilerParams(
            dimension_semantics=("parallel",)),
    )(x_g, w_attn, b_attn2, w_proj, b_proj2)

    # free reshape back to NCHW (kernel already produced feature-major layout)
    return out_g.reshape(B, C, H, W)


def _reference(x_nchw, w_attn, b_attn, w_proj, b_proj, n_head):
    """Plain-JAX reference mirroring the PyTorch module (eval mode)."""
    B, C, H, W = x_nchw.shape
    T = H * W
    hd = C // n_head
    x = jnp.transpose(x_nchw.reshape(B, C, T), (0, 2, 1))                 # (B, T, C)
    qkv = x @ w_attn + b_attn                                             # (B, T, 3C)
    q, k, v = jnp.split(qkv, 3, axis=2)
    q = q.reshape(B, T, n_head, hd).transpose(0, 2, 1, 3)
    k = k.reshape(B, T, n_head, hd).transpose(0, 2, 1, 3)
    v = v.reshape(B, T, n_head, hd).transpose(0, 2, 1, 3)
    s = jnp.einsum("bhqd,bhkd->bhqk", q, k) / jnp.sqrt(hd)
    p = jax.nn.softmax(s, axis=-1)
    y = jnp.einsum("bhqk,bhkd->bhqd", p, v)
    y = y.transpose(0, 2, 1, 3).reshape(B, T, C)
    y = y @ w_proj + b_proj                                               # dropout = identity (eval)
    return jnp.transpose(y, (0, 2, 1)).reshape(B, C, H, W)


if __name__ == "__main__":
    B, C, HEADS, H, W = 2, 64, 4, 8, 8

    key = jax.random.PRNGKey(0)
    k1, k2, k3, k4, k5 = jax.random.split(key, 5)

    x = jax.random.normal(k1, (B, C, H, W), dtype=jnp.float32)
    # Synthetic params, (in, out) layout (equivalent to PyTorch weight.T)
    w_attn = 0.1 * jax.random.normal(k2, (C, 3 * C), dtype=jnp.float32)
    b_attn = 0.1 * jax.random.normal(k3, (3 * C,), dtype=jnp.float32)
    w_proj = 0.1 * jax.random.normal(k4, (C, C), dtype=jnp.float32)
    b_proj = 0.1 * jax.random.normal(k5, (C,), dtype=jnp.float32)

    out = self_attention_forward(x, w_attn, b_attn, w_proj, b_proj, HEADS)
    out = jax.block_until_ready(out)

    ref = _reference(x, w_attn, b_attn, w_proj, b_proj, HEADS)
    np.testing.assert_allclose(np.asarray(out), np.asarray(ref), rtol=1e-3, atol=1e-3)
    assert out.shape == (B, C, H, W)

    print("KERNEL_OK")
</pallas_src>

<mosaic_0001>
module attributes {stable_mosaic.version = 11 : i64} {
  func.func @_self_attention_kernel(%arg0: i32, %arg1: memref<1x1x64x64xf32, #tpu.memory_space<vmem>>, %arg2: memref<64x192xf32, #tpu.memory_space<vmem>>, %arg3: memref<1x192xf32, #tpu.memory_space<vmem>>, %arg4: memref<64x64xf32, #tpu.memory_space<vmem>>, %arg5: memref<1x64xf32, #tpu.memory_space<vmem>>, %arg6: memref<1x1x64x64xf32, #tpu.memory_space<vmem>>, %arg7: memref<64x192xf32, #tpu.memory_space<vmem>>) attributes {dimension_semantics = [#tpu.dimension_semantics<parallel>], iteration_bounds = array<i64: 2>, scalar_prefetch = 0 : i64, scratch_operands = 1 : i64, tpu.core_type = #tpu.core_type<tc>, window_params = [{transform_indices = @transform_0, window_bounds = array<i64: 1, 1, 64, 64>}, {pipeline_mode = #tpu.pipeline_mode<synchronous>, transform_indices = @transform_1, window_bounds = array<i64: 64, 192>}, {pipeline_mode = #tpu.pipeline_mode<synchronous>, transform_indices = @transform_2, window_bounds = array<i64: 1, 192>}, {pipeline_mode = #tpu.pipeline_mode<synchronous>, transform_indices = @transform_3, window_bounds = array<i64: 64, 64>}, {pipeline_mode = #tpu.pipeline_mode<synchronous>, transform_indices = @transform_4, window_bounds = array<i64: 1, 64>}, {transform_indices = @transform_5, window_bounds = array<i64: 1, 1, 64, 64>}]} {
    %c0 = arith.constant 0 : index
    %c0_0 = arith.constant 0 : index
    %c0_1 = arith.constant 0 : index
    %c0_2 = arith.constant 0 : index
    %0 = vector.load %arg1[%c0, %c0_0, %c0_1, %c0_2] : memref<1x1x64x64xf32, #tpu.memory_space<vmem>>, vector<1x1x64x64xf32>
    %1 = vector.shape_cast %0 : vector<1x1x64x64xf32> to vector<64x64xf32>
    %2 = tpu.transpose %1, [1, 0] : vector<64x64xf32> -> vector<64x64xf32>
    %c0_3 = arith.constant 0 : index
    %c0_4 = arith.constant 0 : index
    %3 = vector.load %arg2[%c0_3, %c0_4] : memref<64x192xf32, #tpu.memory_space<vmem>>, vector<64x192xf32>
    %cst = arith.constant dense<0.000000e+00> : vector<64x192xf32>
    %4 = tpu.matmul %2, %3, %cst {dimension_numbers = #tpu.dot_dimension_numbers<[1], [0], [0], [1], [0, 0, 1, 1], [], []>} : vector<64x64xf32>, vector<64x192xf32>, vector<64x192xf32> -> vector<64x192xf32>
    %c0_5 = arith.constant 0 : index
    %c0_6 = arith.constant 0 : index
    %5 = vector.load %arg3[%c0_5, %c0_6] : memref<1x192xf32, #tpu.memory_space<vmem>>, vector<1x192xf32>
    %6 = vector.broadcast %5 : vector<1x192xf32> to vector<64x192xf32>
    %7 = arith.addf %4, %6 : vector<64x192xf32>
    %c0_7 = arith.constant 0 : index
    %c0_8 = arith.constant 0 : index
    %8 = vector.load %arg7[%c0_7, %c0_8] : memref<64x192xf32, #tpu.memory_space<vmem>>, vector<64x192xf32>
    tpu.vector_store %arg7[%c0_7, %c0_8], %7 {strides = array<i32>} : memref<64x192xf32, #tpu.memory_space<vmem>>, vector<64x192xf32>,
    %c0_9 = arith.constant 0 : index
    %c0_10 = arith.constant 0 : index
    %9 = vector.load %arg7[%c0_9, %c0_10] : memref<64x192xf32, #tpu.memory_space<vmem>>, vector<64x16xf32>
    %cst_11 = arith.constant 2.500000e-01 : f32
    %10 = vector.broadcast %cst_11 : f32 to vector<64x16xf32>
    %11 = arith.mulf %9, %10 : vector<64x16xf32>
    %c0_12 = arith.constant 0 : index
    %c64 = arith.constant 64 : index
    %12 = vector.load %arg7[%c0_12, %c64] : memref<64x192xf32, #tpu.memory_space<vmem>>, vector<64x16xf32>
    %c0_13 = arith.constant 0 : index
    %c128 = arith.constant 128 : index
    %13 = vector.load %arg7[%c0_13, %c128] : memref<64x192xf32, #tpu.memory_space<vmem>>, vector<64x16xf32>
    %cst_14 = arith.constant dense<0.000000e+00> : vector<64x64xf32>
    %14 = tpu.matmul %11, %12, %cst_14 {dimension_numbers = #tpu.dot_dimension_numbers<[1], [1], [0], [0], [0, 0, 1, 0], [], []>} : vector<64x16xf32>, vector<64x16xf32>, vector<64x64xf32> -> vector<64x64xf32>
    %cst_15 = arith.constant dense<0xFF800000> : vector<64xf32>
    %15 = vector.multi_reduction <maximumf>, %14, %cst_15 [1] : vector<64x64xf32> to vector<64xf32>
    %16 = vector.shape_cast %15 : vector<64xf32> to vector<64x1xf32>
    %17 = vector.broadcast %16 : vector<64x1xf32> to vector<64x64xf32>
    %18 = arith.subf %14, %17 : vector<64x64xf32>
    %19 = math.exp %18 : vector<64x64xf32>
    %cst_16 = arith.constant dense<0.000000e+00> : vector<64x16xf32>
    %20 = tpu.matmul %19, %13, %cst_16 {dimension_numbers = #tpu.dot_dimension_numbers<[1], [0], [0], [1], [0, 0, 1, 1], [], []>} : vector<64x64xf32>, vector<64x16xf32>, vector<64x16xf32> -> vector<64x16xf32>
    %cst_17 = arith.constant dense<0.000000e+00> : vector<64xf32>
    %21 = vector.multi_reduction <add>, %19, %cst_17 [1] : vector<64x64xf32> to vector<64xf32>
    %22 = vector.shape_cast %21 : vector<64xf32> to vector<64x1xf32>
    %23 = tpu.reciprocal %22 : vector<64x1xf32> -> vector<64x1xf32>
    %24 = vector.broadcast %23 : vector<64x1xf32> to vector<64x16xf32>
    %25 = arith.mulf %20, %24 : vector<64x16xf32>
    %c0_18 = arith.constant 0 : index
    %c16 = arith.constant 16 : index
    %26 = vector.load %arg7[%c0_18, %c16] : memref<64x192xf32, #tpu.memory_space<vmem>>, vector<64x16xf32>
    %cst_19 = arith.constant 2.500000e-01 : f32
    %27 = vector.broadcast %cst_19 : f32 to vector<64x16xf32>
    %28 = arith.mulf %26, %27 : vector<64x16xf32>
    %c0_20 = arith.constant 0 : index
    %c80 = arith.constant 80 : index
    %29 = vector.load %arg7[%c0_20, %c80] : memref<64x192xf32, #tpu.memory_space<vmem>>, vector<64x16xf32>
    %c0_21 = arith.constant 0 : index
    %c144 = arith.constant 144 : index
    %30 = vector.load %arg7[%c0_21, %c144] : memref<64x192xf32, #tpu.memory_space<vmem>>, vector<64x16xf32>
    %cst_22 = arith.constant dense<0.000000e+00> : vector<64x64xf32>
    %31 = tpu.matmul %28, %29, %cst_22 {dimension_numbers = #tpu.dot_dimension_numbers<[1], [1], [0], [0], [0, 0, 1, 0], [], []>} : vector<64x16xf32>, vector<64x16xf32>, vector<64x64xf32> -> vector<64x64xf32>
    %cst_23 = arith.constant dense<0xFF800000> : vector<64xf32>
    %32 = vector.multi_reduction <maximumf>, %31, %cst_23 [1] : vector<64x64xf32> to vector<64xf32>
    %33 = vector.shape_cast %32 : vector<64xf32> to vector<64x1xf32>
    %34 = vector.broadcast %33 : vector<64x1xf32> to vector<64x64xf32>
    %35 = arith.subf %31, %34 : vector<64x64xf32>
    %36 = math.exp %35 : vector<64x64xf32>
    %cst_24 = arith.constant dense<0.000000e+00> : vector<64x16xf32>
    %37 = tpu.matmul %36, %30, %cst_24 {dimension_numbers = #tpu.dot_dimension_numbers<[1], [0], [0], [1], [0, 0, 1, 1], [], []>} : vector<64x64xf32>, vector<64x16xf32>, vector<64x16xf32> -> vector<64x16xf32>
    %cst_25 = arith.constant dense<0.000000e+00> : vector<64xf32>
    %38 = vector.multi_reduction <add>, %36, %cst_25 [1] : vector<64x64xf32> to vector<64xf32>
    %39 = vector.shape_cast %38 : vector<64xf32> to vector<64x1xf32>
    %40 = tpu.reciprocal %39 : vector<64x1xf32> -> vector<64x1xf32>
    %41 = vector.broadcast %40 : vector<64x1xf32> to vector<64x16xf32>
    %42 = arith.mulf %37, %41 : vector<64x16xf32>
    %c0_26 = arith.constant 0 : index
    %c32 = arith.constant 32 : index
    %43 = vector.load %arg7[%c0_26, %c32] : memref<64x192xf32, #tpu.memory_space<vmem>>, vector<64x16xf32>
    %cst_27 = arith.constant 2.500000e-01 : f32
    %44 = vector.broadcast %cst_27 : f32 to vector<64x16xf32>
    %45 = arith.mulf %43, %44 : vector<64x16xf32>
    %c0_28 = arith.constant 0 : index
    %c96 = arith.constant 96 : index
    %46 = vector.load %arg7[%c0_28, %c96] : memref<64x192xf32, #tpu.memory_space<vmem>>, vector<64x16xf32>
    %c0_29 = arith.constant 0 : index
    %c160 = arith.constant 160 : index
    %47 = vector.load %arg7[%c0_29, %c160] : memref<64x192xf32, #tpu.memory_space<vmem>>, vector<64x16xf32>
    %cst_30 = arith.constant dense<0.000000e+00> : vector<64x64xf32>
    %48 = tpu.matmul %45, %46, %cst_30 {dimension_numbers = #tpu.dot_dimension_numbers<[1], [1], [0], [0], [0, 0, 1, 0], [], []>} : vector<64x16xf32>, vector<64x16xf32>, vector<64x64xf32> -> vector<64x64xf32>
    %cst_31 = arith.constant dense<0xFF800000> : vector<64xf32>
    %49 = vector.multi_reduction <maximumf>, %48, %cst_31 [1] : vector<64x64xf32> to vector<64xf32>
    %50 = vector.shape_cast %49 : vector<64xf32> to vector<64x1xf32>
    %51 = vector.broadcast %50 : vector<64x1xf32> to vector<64x64xf32>
    %52 = arith.subf %48, %51 : vector<64x64xf32>
    %53 = math.exp %52 : vector<64x64xf32>
    %cst_32 = arith.constant dense<0.000000e+00> : vector<64x16xf32>
    %54 = tpu.matmul %53, %47, %cst_32 {dimension_numbers = #tpu.dot_dimension_numbers<[1], [0], [0], [1], [0, 0, 1, 1], [], []>} : vector<64x64xf32>, vector<64x16xf32>, vector<64x16xf32> -> vector<64x16xf32>
    %cst_33 = arith.constant dense<0.000000e+00> : vector<64xf32>
    %55 = vector.multi_reduction <add>, %53, %cst_33 [1] : vector<64x64xf32> to vector<64xf32>
    %56 = vector.shape_cast %55 : vector<64xf32> to vector<64x1xf32>
    %57 = tpu.reciprocal %56 : vector<64x1xf32> -> vector<64x1xf32>
    %58 = vector.broadcast %57 : vector<64x1xf32> to vector<64x16xf32>
    %59 = arith.mulf %54, %58 : vector<64x16xf32>
    %c0_34 = arith.constant 0 : index
    %c48 = arith.constant 48 : index
    %60 = vector.load %arg7[%c0_34, %c48] : memref<64x192xf32, #tpu.memory_space<vmem>>, vector<64x16xf32>
    %cst_35 = arith.constant 2.500000e-01 : f32
    %61 = vector.broadcast %cst_35 : f32 to vector<64x16xf32>
    %62 = arith.mulf %60, %61 : vector<64x16xf32>
    %c0_36 = arith.constant 0 : index
    %c112 = arith.constant 112 : index
    %63 = vector.load %arg7[%c0_36, %c112] : memref<64x192xf32, #tpu.memory_space<vmem>>, vector<64x16xf32>
    %c0_37 = arith.constant 0 : index
    %c176 = arith.constant 176 : index
    %64 = vector.load %arg7[%c0_37, %c176] : memref<64x192xf32, #tpu.memory_space<vmem>>, vector<64x16xf32>
    %cst_38 = arith.constant dense<0.000000e+00> : vector<64x64xf32>
    %65 = tpu.matmul %62, %63, %cst_38 {dimension_numbers = #tpu.dot_dimension_numbers<[1], [1], [0], [0], [0, 0, 1, 0], [], []>} : vector<64x16xf32>, vector<64x16xf32>, vector<64x64xf32> -> vector<64x64xf32>
    %cst_39 = arith.constant dense<0xFF800000> : vector<64xf32>
    %66 = vector.multi_reduction <maximumf>, %65, %cst_39 [1] : vector<64x64xf32> to vector<64xf32>
    %67 = vector.shape_cast %66 : vector<64xf32> to vector<64x1xf32>
    %68 = vector.broadcast %67 : vector<64x1xf32> to vector<64x64xf32>
    %69 = arith.subf %65, %68 : vector<64x64xf32>
    %70 = math.exp %69 : vector<64x64xf32>
    %cst_40 = arith.constant dense<0.000000e+00> : vector<64x16xf32>
    %71 = tpu.matmul %70, %64, %cst_40 {dimension_numbers = #tpu.dot_dimension_numbers<[1], [0], [0], [1], [0, 0, 1, 1], [], []>} : vector<64x64xf32>, vector<64x16xf32>, vector<64x16xf32> -> vector<64x16xf32>
    %cst_41 = arith.constant dense<0.000000e+00> : vector<64xf32>
    %72 = vector.multi_reduction <add>, %70, %cst_41 [1] : vector<64x64xf32> to vector<64xf32>
    %73 = vector.shape_cast %72 : vector<64xf32> to vector<64x1xf32>
    %74 = tpu.reciprocal %73 : vector<64x1xf32> -> vector<64x1xf32>
    %75 = vector.broadcast %74 : vector<64x1xf32> to vector<64x16xf32>
    %76 = arith.mulf %71, %75 : vector<64x16xf32>
    %77 = tpu.concatenate %25, %42, %59, %76 in 1 : vector<64x16xf32>, vector<64x16xf32>, vector<64x16xf32>, vector<64x16xf32> -> vector<64x64xf32>
    %c0_42 = arith.constant 0 : index
    %c0_43 = arith.constant 0 : index
    %78 = vector.load %arg4[%c0_42, %c0_43] : memref<64x64xf32, #tpu.memory_space<vmem>>, vector<64x64xf32>
    %cst_44 = arith.constant dense<0.000000e+00> : vector<64x64xf32>
    %79 = tpu.matmul %77, %78, %cst_44 {dimension_numbers = #tpu.dot_dimension_numbers<[1], [0], [0], [1], [0, 0, 1, 1], [], []>} : vector<64x64xf32>, vector<64x64xf32>, vector<64x64xf32> -> vector<64x64xf32>
    %c0_45 = arith.constant 0 : index
    %c0_46 = arith.constant 0 : index
    %80 = vector.load %arg5[%c0_45, %c0_46] : memref<1x64xf32, #tpu.memory_space<vmem>>, vector<1x64xf32>
    %81 = vector.broadcast %80 : vector<1x64xf32> to vector<64x64xf32>
    %82 = arith.addf %79, %81 : vector<64x64xf32>
    %83 = tpu.transpose %82, [1, 0] : vector<64x64xf32> -> vector<64x64xf32>
    %c0_47 = arith.constant 0 : index
    %c0_48 = arith.constant 0 : index
    %c0_49 = arith.constant 0 : index
    %c0_50 = arith.constant 0 : index
    %84 = vector.load %arg6[%c0_47, %c0_48, %c0_49, %c0_50] : memref<1x1x64x64xf32, #tpu.memory_space<vmem>>, vector<1x1x64x64xf32>
    %85 = vector.shape_cast %84 : vector<1x1x64x64xf32> to vector<64x64xf32>
    %86 = vector.shape_cast %83 : vector<64x64xf32> to vector<1x1x64x64xf32>
    tpu.vector_store %arg6[%c0_47, %c0_48, %c0_49, %c0_50], %86 {strides = array<i32>} : memref<1x1x64x64xf32, #tpu.memory_space<vmem>>, vector<1x1x64x64xf32>,
    return
  }
  func.func @transform_0(%arg0: i32) -> (i32, i32, i32, i32) {
    %c0_i32 = arith.constant 0 : i32
    %c0_i32_0 = arith.constant 0 : i32
    %c0_i32_1 = arith.constant 0 : i32
    %c0_i32_2 = arith.constant 0 : i32
    return %arg0, %c0_i32, %c0_i32_0, %c0_i32_1 : i32, i32, i32, i32
  }
  func.func @transform_1(%arg0: i32) -> (i32, i32) {
    %c0_i32 = arith.constant 0 : i32
    %c0_i32_0 = arith.constant 0 : i32
    %c0_i32_1 = arith.constant 0 : i32
    return %c0_i32, %c0_i32_0 : i32, i32
  }
  func.func @transform_2(%arg0: i32) -> (i32, i32) {
    %c0_i32 = arith.constant 0 : i32
    %c0_i32_0 = arith.constant 0 : i32
    %c0_i32_1 = arith.constant 0 : i32
    return %c0_i32, %c0_i32_0 : i32, i32
  }
  func.func @transform_3(%arg0: i32) -> (i32, i32) {
    %c0_i32 = arith.constant 0 : i32
    %c0_i32_0 = arith.constant 0 : i32
    %c0_i32_1 = arith.constant 0 : i32
    return %c0_i32, %c0_i32_0 : i32, i32
  }
  func.func @transform_4(%arg0: i32) -> (i32, i32) {
    %c0_i32 = arith.constant 0 : i32
    %c0_i32_0 = arith.constant 0 : i32
    %c0_i32_1 = arith.constant 0 : i32
    return %c0_i32, %c0_i32_0 : i32, i32
  }
  func.func @transform_5(%arg0: i32) -> (i32, i32, i32, i32) {
    %c0_i32 = arith.constant 0 : i32
    %c0_i32_0 = arith.constant 0 : i32
    %c0_i32_1 = arith.constant 0 : i32
    %c0_i32_2 = arith.constant 0 : i32
    return %arg0, %c0_i32, %c0_i32_0, %c0_i32_1 : i32, i32, i32, i32
  }
}

</mosaic_0001>

<bundles_post_ra>
// kernel: self_attention_forward.1
= control target key start
LH: loop header
LB: loop body
LE: loop exit
PB: predicated region body
PF: predicated region fallthrough
CT: control target
= control target key end

     0   :  { %s3187_s18 = smov 0   ;;  %s4159_s0 = inlined_call_operand.vmem [shape: f32[2,1,64,64], index: 0, kind: input, shape index: {}]   ;;  %s4160_s1 = inlined_call_operand.vmem [shape: f32[64,192], index: 1, kind: input, shape index: {}]   ;;  %s4161_s2 = inlined_call_operand.vmem [shape: f32[1,192], index: 2, kind: input, shape index: {}]   ;;  %s4162_s3 = inlined_call_operand.vmem [shape: f32[64,64], index: 3, kind: input, shape index: {}]   ;;  %s4163_s4 = inlined_call_operand.vmem [shape: f32[1,64], index: 4, kind: input, shape index: {}]   ;;  %s4164_s5 = inlined_call_operand.vmem [shape: f32[2,1,64,64], index: 5, kind: output, shape index: {}]  }
   0x1 LB: > { %s2457_s19 = sadd.s32 4294967295, %s3147_s18   ;;  %p2461_p0 = scmp.ge.s32.totalorder %s3147_s18, 1  ;;  %s3147_s18 = sphi %s3187_s18, %s15_s18  }
   0x2   : > { %p187_p1 = scmp.lt.s32.totalorder %s3147_s18, 3 }
   0x4   : > { %p188_p2 = pnand %p2461_p0, %p187_p1 }
   0x5   : > { %p215_p3 = scmp.lt.s32.totalorder (!%p188_p2), %s2457_s19, 1  ;;  %s3150_s11 = smov (!%p188_p2), 48  }
   0x6   : > { %191 = sbr.rel (%p188_p2) target bundleno = 2496 (0x9c0), region = 40  ;;  %s3152_s13 = smov (!%p188_p2), 112  }
   0x7   : > { %s3153_s14 = smov (!%p188_p2), 32   ;;  %s3154_s15 = smov (!%p188_p2), 96  }
   0x8   : > { %s3155_s16 = smov (!%p188_p2), 16   ;;  %s3156_s17 = smov (!%p188_p2), 80  }
   0xb   : > { %v280_v0 = vld [vmem:[%s4160_s1 + $0x78] sm:$0xff]  ;;  %v279_v1 = vld [vmem:[%s4160_s1 + $0x70] sm:$0xff]  ;;  %v278_v2 = vld [vmem:[%s4160_s1 + $0x68] sm:$0xff]  ;;  %v3149_v4 = vmov 0.0   ;;  %s4166_s19 = smov (!%p215_p3, %s2457_s19), 1  ;;  %vm293_vm0 = vcmask 523264   ;;  %v283_v33 = vlaneseq }
   0xc   : > { %334 = vmatprep.subr.mxu0 %v280_v0  ;;  %v277_v3 = vld [vmem:[%s4160_s1 + $0x60] sm:$0xff]  ;;  %382 = vmatprep.mubr.f32.mxu0 %v3149_v4  ;;  %v276_v5 = vld [vmem:[%s4160_s1 + $0x58] sm:$0xff]  ;;  %v275_v6 = vld [vmem:[%s4160_s1 + $0x50] sm:$0xff]  ;;  %s2581_s7 = sshll.u32 %s4166_s19, 6  ;;  %vm495_vm1 = vcmask 130048   ;;  %vm2200_vm2 = vcmask 261120  }
   0xd   : > { %335 = vmatpush1.msra.mxu0 %v279_v1  ;;  %v274_v7 = vld [vmem:[%s4160_s1 + $0x48] sm:$0xff]  ;;  %s3225_s12 = scalar_lea.vmem %s4159_s0, %s2581_s7  ;;  %v273_v8 = vld [vmem:[%s4160_s1 + $0x40] sm:$0xff]  ;;  %v272_v10 = vld [vmem:[%s4160_s1 + $0x38] sm:$0xff]  ;;  %v284_v34 = vshrl.u32 %v283_v33, 7  ;;  %vm2209_vm3 = vcmask 392192  }
   0xe   : > { %336 = vmatprep.subr.mxu0 %v278_v2  ;;  %v225_v9 = vld [vmem:[%s3225_s12] sm:$0xff]  ;;  %v271_v11 = vld [vmem:[%s4160_s1 + $0x30] sm:$0xff]  ;;  %v226_v12 = vld [vmem:[%s3225_s12 + $0x8] sm:$0xff] }
   0xf   : > { %337 = vmatpush1.msra.mxu0 %v277_v3  ;;  %233 = vxpose.xlu0.b32.start [1/8] (short) (narrow) %v225_v9, 64  ;;  %v270_v13 = vld [vmem:[%s4160_s1 + $0x28] sm:$0xff]  ;;  %v269_v14 = vld [vmem:[%s4160_s1 + $0x20] sm:$0xff]  ;;  %v268_v15 = vld [vmem:[%s4160_s1 + $0x18] sm:$0xff]  ;;  %v285_v35 = vsub.s32 0, %v284_v34  ;;  %v289_v37 = vsub.s32 1, %v284_v34 }
  0x10   : > { %338 = vmatprep.subr.mxu0 %v276_v5  ;;  %v267_v16 = vld [vmem:[%s4160_s1 + $0x10] sm:$0xff]  ;;  %v266_v18 = vld [vmem:[%s4160_s1 + $0x8] sm:$0xff]  ;;  %v265_v19 = vld [vmem:[%s4160_s1] sm:$0xff] }
  0x11   : > { %339 = vmatpush1.msra.mxu0 %v275_v6  ;;  %v227_v17 = vld [vmem:[%s3225_s12 + $0x10] sm:$0xff]  ;;  %v228_v20 = vld [vmem:[%s3225_s12 + $0x18] sm:$0xff]  ;;  %v229_v21 = vld [vmem:[%s3225_s12 + $0x20] sm:$0xff] }
  0x12   : > { %340 = vmatprep.subr.mxu0 %v274_v7  ;;  %v230_v22 = vld [vmem:[%s3225_s12 + $0x28] sm:$0xff]  ;;  %v231_v23 = vld [vmem:[%s3225_s12 + $0x30] sm:$0xff]  ;;  %v232_v24 = vld [vmem:[%s3225_s12 + $0x38] sm:$0xff]  ;;  %s3151_s12 = smov 64  }
  0x13   : > { %341 = vmatpush1.msra.mxu0 %v273_v8  ;;  %234 = vxpose.xlu0.b32.cont [2/8] (short) (narrow) %v226_v12, 64  ;;  %v281_v36 = vld [vmem:[%s4161_s2] sm:$0x3] }
  0x14   : > { %342 = vmatprep.subr.mxu0 %v272_v10  ;;  %v286_v38 = vrot.slane %v281_v36, %v285_v35  ;;  %v290_v39 = vrot.slane %v281_v36, %v289_v37 }
  0x15   : > { %343 = vmatpush1.msra.mxu0 %v271_v11 }
  0x16   : > { %344 = vmatprep.subr.mxu0 %v270_v13 }
  0x17   : > { %345 = vmatpush1.msra.mxu0 %v269_v14  ;;  %235 = vxpose.xlu0.b32.cont [3/8] (short) (narrow) %v227_v17, 64 }
  0x18   : > { %346 = vmatprep.subr.mxu0 %v268_v15 }
  0x19   : > { %347 = vmatpush1.msra.mxu0 %v267_v16 }
  0x1a   : > { %348 = vmatprep.subr.mxu0 %v266_v18 }
  0x1b   : > { %349 = vmatpush1.msra.mxu0 %v265_v19  ;;  %236 = vxpose.xlu0.b32.cont [4/8] (short) (narrow) %v228_v20, 64 }
  0x1f   : > { %237 = vxpose.xlu0.b32.cont [5/8] (short) (narrow) %v229_v21, 64 }
  0x23   : > { %238 = vxpose.xlu0.b32.cont [6/8] (short) (narrow) %v230_v22, 64 }
  0x27   : > { %239 = vxpose.xlu0.b32.cont [7/8] (short) (narrow) %v231_v23, 64 }
  0x2b   : > { %240 = vxpose.xlu0.b32.end [8/8] (short) (narrow) %v232_v24, 64 }
  0x8b   : > { %v249_v25 = vpop.trf.xlu0 }
  0x8c   : > { %2466 = vmatmul.mubr.msk.f32.vlgmr.msra.gmra.mxu0 %vm293_vm0, %v249_v25 }
  0x8d   : > { %388 = vmatprep.mubr.f32.mxu0 %v3149_v4 }
  0x8f   : > { %v250_v26 = vpop.trf.xlu0 }
  0x90   : > { %2467 = vmatmul.mubr.msk.f32.gmra.mxu0 %vm293_vm0, %v250_v26 }
  0x91   : > { %394 = vmatprep.mubr.f32.mxu0 %v3149_v4 }
  0x93   : > { %v251_v27 = vpop.trf.xlu0 }
  0x94   : > { %2468 = vmatmul.mubr.msk.f32.gmra.mxu0 %vm293_vm0, %v251_v27 }
  0x95   : > { %400 = vmatprep.mubr.f32.mxu0 %v3149_v4 }
  0x97   : > { %v252_v28 = vpop.trf.xlu0 }
  0x98   : > { %2469 = vmatmul.mubr.msk.f32.gmra.mxu0 %vm293_vm0, %v252_v28 }
  0x99   : > { %406 = vmatprep.mubr.f32.mxu0 %v3149_v4 }
  0x9b   : > { %v253_v29 = vpop.trf.xlu0 }
  0x9c   : > { %2470 = vmatmul.mubr.msk.f32.gmra.mxu0 %vm293_vm0, %v253_v29 }
  0x9d   : > { %412 = vmatprep.mubr.f32.mxu0 %v3149_v4 }
  0x9f   : > { %v254_v30 = vpop.trf.xlu0 }
  0xa0   : > { %2471 = vmatmul.mubr.msk.f32.gmra.mxu0 %vm293_vm0, %v254_v30 }
  0xa1   : > { %418 = vmatprep.mubr.f32.mxu0 %v3149_v4 }
  0xa3   : > { %v255_v31 = vpop.trf.xlu0 }
  0xa4   : > { %2472 = vmatmul.mubr.msk.f32.gmra.mxu0 %vm293_vm0, %v255_v31 }
  0xa5   : > { %424 = vmatprep.mubr.f32.mxu0 %v3149_v4 }
  0xa7   : > { %v256_v32 = vpop.trf.xlu0 }
  0xa8   : > { %2473 = vmatmul.mubr.msk.f32.gmra.mxu0 %vm293_vm0, %v256_v32 }
 0x14c   : > { %v384_v40 = vpop.f32.mrf.mxu0 }
 0x14d   : > { %v3280_v41 = vadd.f32 %v384_v40, %v286_v38 }
 0x14e   : > { %v386_v42 = vpop.f32.mrf.mxu0 }
 0x14f   : > { %v387_v43 = vadd.f32 %v386_v42, %v290_v39  ;;  %v3283_v44 = vmul.f32 0.25, %v3280_v41 }
 0x150   : > { %v390_v45 = vpop.f32.mrf.mxu0 }
 0x151   : > { %432 = vst.msk [vmem:[#allocation2 + $0x8] sm:$0xff] %vm293_vm0, %v387_v43  ;;  %v3286_v46 = vadd.f32 %v390_v45, %v286_v38  ;;  %2743 = vmatprep.mubr.msk.f32.mxu1 %vm495_vm1, %v3283_v44 }
 0x152   : > { %v392_v47 = vpop.f32.mrf.mxu0 }
 0x153   : > { %v393_v48 = vadd.f32 %v392_v47, %v290_v39  ;;  %v3396_v19 = vmul.f32 0.25, %v3286_v46 }
 0x154   : > { %v396_v49 = vpop.f32.mrf.mxu0 }
 0x155   : > { %434 = vst.msk [vmem:[#allocation2 + $0x18] sm:$0xff] %vm293_vm0, %v393_v48  ;;  %v3291_v50 = vadd.f32 %v396_v49, %v286_v38 }
 0x156   : > { %v398_v51 = vpop.f32.mrf.mxu0 }
 0x157   : > { %v399_v52 = vadd.f32 %v398_v51, %v290_v39  ;;  %v3401_v20 = vmul.f32 0.25, %v3291_v50 }
 0x158   : > { %v402_v53 = vpop.f32.mrf.mxu0  ;;  %v3357_v17 = vld [vmem:[#allocation2 + $0x8] sm:$0xff] }
 0x159   : > { %436 = vst.msk [vmem:[#allocation2 + $0x28] sm:$0xff] %vm293_vm0, %v399_v52  ;;  %v3294_v54 = vadd.f32 %v402_v53, %v286_v38 }
 0x15a   : > { %v404_v55 = vpop.f32.mrf.mxu0 }
 0x15b   : > { %v405_v56 = vadd.f32 %v404_v55, %v290_v39  ;;  %v3406_v21 = vmul.f32 0.25, %v3294_v54 }
 0x15c   : > { %v408_v57 = vpop.f32.mrf.mxu0  ;;  %v3363_v18 = vld [vmem:[#allocation2 + $0x18] sm:$0xff] }
 0x15d   : > { %438 = vst.msk [vmem:[#allocation2 + $0x38] sm:$0xff] %vm293_vm0, %v405_v56  ;;  %v3297_v58 = vadd.f32 %v408_v57, %v286_v38 }
 0x15e   : > { %v410_v59 = vpop.f32.mrf.mxu0 }
 0x15f   : > { %v411_v60 = vadd.f32 %v410_v59, %v290_v39  ;;  %v3314_v9 = vmul.f32 0.25, %v3297_v58 }
 0x160   : > { %v414_v61 = vpop.f32.mrf.mxu0  ;;  %v3345_v15 = vld [vmem:[#allocation2 + $0x28] sm:$0xff] }
 0x161   : > { %440 = vst.msk [vmem:[#allocation2 + $0x48] sm:$0xff] %vm293_vm0, %v411_v60  ;;  %v3300_v62 = vadd.f32 %v414_v61, %v286_v38 }
 0x162   : > { %v416_v63 = vpop.f32.mrf.mxu0 }
 0x163   : > { %v417_v0 = vadd.f32 %v416_v63, %v290_v39  ;;  %v3411_v22 = vmul.f32 0.25, %v3300_v62 }
 0x164   : > { %v420_v1 = vpop.f32.mrf.mxu0  ;;  %v3351_v16 = vld [vmem:[#allocation2 + $0x38] sm:$0xff] }
 0x165   : > { %442 = vst.msk [vmem:[#allocation2 + $0x58] sm:$0xff] %vm293_vm0, %v417_v0  ;;  %v3303_v2 = vadd.f32 %v420_v1, %v286_v38 }
 0x166   : > { %v422_v3 = vpop.f32.mrf.mxu0 }
 0x167   : > { %v423_v4 = vadd.f32 %v422_v3, %v290_v39  ;;  %v3321_v10 = vmul.f32 0.25, %v3303_v2 }
 0x168   : > { %v426_v5 = vpop.f32.mrf.mxu0  ;;  %v3333_v13 = vld [vmem:[#allocation2 + $0x48] sm:$0xff] }
 0x169   : > { %444 = vst.msk [vmem:[#allocation2 + $0x68] sm:$0xff] %vm293_vm0, %v423_v4  ;;  %v3306_v6 = vadd.f32 %v426_v5, %v286_v38 }
 0x16a   : > { %v428_v7 = vpop.f32.mrf.mxu0 }
 0x16b   : > { %v429_v8 = vadd.f32 %v428_v7, %v290_v39  ;;  %888 = vrot.lane.b32.xlu0 %v3306_v6, %s3150_s11  ;;  %493 = vrot.lane.b32.xlu1 %v3306_v6, %s3151_s12  ;;  %v3416_v23 = vmul.f32 0.25, %v3306_v6 }
 0x16c   : > { %v3339_v14 = vld [vmem:[#allocation2 + $0x58] sm:$0xff] }
 0x16d   : > { %446 = vst.msk [vmem:[#allocation2 + $0x78] sm:$0xff] %vm293_vm0, %v429_v8 }
 0x16f   : > { %866 = vrot.lane.b32.xlu0 %v3314_v9, %s3152_s13  ;;  %491 = vrot.lane.b32.xlu1 %v3303_v2, %s3151_s12 }
 0x170   : > { %v3331_v12 = vld [vmem:[#allocation2 + $0x68] sm:$0xff] }
 0x173   : > { %870 = vrot.lane.b32.xlu0 %v3321_v10, %s3152_s13  ;;  %489 = vrot.lane.b32.xlu1 %v3300_v62, %s3151_s12 }
 0x174   : > { %v3327_v11 = vld [vmem:[#allocation2 + $0x78] sm:$0xff] }
 0x175   : > { %2755 = vmatprep.subr.mxu0 %v3327_v11 }
 0x176   : > { %2756 = vmatpush3.msra.mxu0 %v3327_v11 }
 0x177   : > { %2757 = vmatprep.subr.mxu0 %v3331_v12  ;;  %1091 = vrot.lane.b32.xlu0 %v3333_v13, %s3152_s13 }
 0x178   : > { %2758 = vmatpush3.msra.mxu0 %v3331_v12  ;;  %487 = vrot.lane.b32.xlu1 %v3297_v58, %s3151_s12 }
 0x179   : > { %2759 = vmatprep.subr.mxu0 %v3339_v14 }
 0x17a   : > { %2760 = vmatpush3.msra.mxu0 %v3339_v14 }
 0x17b   : > { %2761 = vmatprep.subr.mxu0 %v3333_v13  ;;  %1087 = vrot.lane.b32.xlu0 %v3345_v15, %s3152_s13 }
 0x17c   : > { %2762 = vmatpush3.msra.mxu0 %v3333_v13  ;;  %485 = vrot.lane.b32.xlu1 %v3294_v54, %s3151_s12 }
 0x17d   : > { %2763 = vmatprep.subr.mxu0 %v3351_v16 }
 0x17e   : > { %2764 = vmatpush3.msra.mxu0 %v3351_v16 }
 0x17f   : > { %2765 = vmatprep.subr.mxu0 %v3345_v15  ;;  %1083 = vrot.lane.b32.xlu0 %v3357_v17, %s3152_s13 }
 0x180   : > { %2766 = vmatpush3.msra.mxu0 %v3345_v15  ;;  %483 = vrot.lane.b32.xlu1 %v3291_v50, %s3151_s12 }
 0x181   : > { %2767 = vmatprep.subr.mxu0 %v3363_v18 }
 0x182   : > { %2768 = vmatpush3.msra.mxu0 %v3363_v18 }
 0x183   : > { %2769 = vmatprep.subr.mxu0 %v3357_v17  ;;  %1302 = vrot.lane.b32.xlu0 %v3300_v62, %s3153_s14 }
 0x184   : > { %2770 = vmatpush3.msra.mxu0 %v3357_v17  ;;  %481 = vrot.lane.b32.xlu1 %v3286_v46, %s3151_s12 }
 0x187   : > { %1097 = vrot.lane.b32.xlu0 %v3327_v11, %s3152_s13 }
 0x188   : > { %479 = vrot.lane.b32.xlu1 %v3280_v41, %s3151_s12 }
 0x18c   : > { %886 = vrot.lane.b32.xlu1 %v3303_v2, %s3150_s11 }
 0x190   : > { %884 = vrot.lane.b32.xlu1 %v3300_v62, %s3150_s11 }
 0x194   : > { %882 = vrot.lane.b32.xlu1 %v3297_v58, %s3150_s11 }
 0x198   : > { %880 = vrot.lane.b32.xlu1 %v3294_v54, %s3150_s11 }
 0x19c   : > { %878 = vrot.lane.b32.xlu1 %v3291_v50, %s3150_s11 }
 0x1a0   : > { %876 = vrot.lane.b32.xlu1 %v3286_v46, %s3150_s11 }
 0x1a4   : > { %874 = vrot.lane.b32.xlu1 %v3280_v41, %s3150_s11 }
 0x1a8   : > { %858 = vrot.lane.b32.xlu1 %v3283_v44, %s3152_s13 }
 0x1ac   : > { %860 = vrot.lane.b32.xlu1 %v3396_v19, %s3152_s13 }
 0x1b0   : > { %862 = vrot.lane.b32.xlu1 %v3401_v20, %s3152_s13 }
 0x1b4   : > { %864 = vrot.lane.b32.xlu1 %v3406_v21, %s3152_s13 }
 0x1b8   : > { %868 = vrot.lane.b32.xlu1 %v3411_v22, %s3152_s13 }
 0x1bc   : > { %872 = vrot.lane.b32.xlu1 %v3416_v23, %s3152_s13 }
 0x1c0   : > { %1095 = vrot.lane.b32.xlu1 %v3331_v12, %s3152_s13 }
 0x1c4   : > { %1093 = vrot.lane.b32.xlu1 %v3339_v14, %s3152_s13 }
 0x1c8   : > { %1089 = vrot.lane.b32.xlu1 %v3351_v16, %s3152_s13 }
 0x1cc   : > { %1085 = vrot.lane.b32.xlu1 %v3363_v18, %s3152_s13 }
 0x1d0   : > { %1306 = vrot.lane.b32.xlu1 %v3306_v6, %s3153_s14 }
 0x1d4   : > { %1304 = vrot.lane.b32.xlu1 %v3303_v2, %s3153_s14 }
 0x1d8   : > { %1300 = vrot.lane.b32.xlu1 %v3297_v58, %s3153_s14 }
 0x1dd   : > { %v889_v24 = vpop.permute.xlu0 %888  ;;  %v494_v25 = vpop.permute.xlu1 %493 }
 0x1de   : > { %2727 = vmatprep.subr.msk.mxu1 %vm495_vm1, %v494_v25 }
 0x1df   : > { %2728 = vmatpush3.xpose.msk.msra.mxu1 %vm495_vm1, %v494_v25 }
 0x1e1   : > { %v3436_v26 = vpop.permute.xlu0 %866  ;;  %v492_v27 = vpop.permute.xlu1 %491 }
 0x1e2   : > { %2729 = vmatprep.subr.msk.mxu1 %vm495_vm1, %v492_v27 }
 0x1e3   : > { %2730 = vmatpush3.xpose.msk.msra.mxu1 %vm495_vm1, %v492_v27 }
 0x1e5   : > { %v3440_v28 = vpop.permute.xlu0 %870  ;;  %v490_v29 = vpop.permute.xlu1 %489 }
 0x1e6   : > { %2731 = vmatprep.subr.msk.mxu1 %vm495_vm1, %v490_v29 }
 0x1e7   : > { %2732 = vmatpush3.xpose.msk.msra.mxu1 %vm495_vm1, %v490_v29 }
 0x1e9   : > { %v3444_v30 = vpop.permute.xlu0 %1091 }
 0x1ea   : > { %v488_v31 = vpop.permute.xlu1 %487 }
 0x1eb   : > { %2733 = vmatprep.subr.msk.mxu1 %vm495_vm1, %v488_v31 }
 0x1ec   : > { %2734 = vmatpush3.xpose.msk.msra.mxu1 %vm495_vm1, %v488_v31 }
 0x1ed   : > { %v3448_v32 = vpop.permute.xlu0 %1087 }
 0x1ee   : > { %v486_v33 = vpop.permute.xlu1 %485 }
 0x1ef   : > { %2735 = vmatprep.subr.msk.mxu1 %vm495_vm1, %v486_v33 }
 0x1f0   : > { %2736 = vmatpush3.xpose.msk.msra.mxu1 %vm495_vm1, %v486_v33 }
 0x1f1   : > { %v3452_v34 = vpop.permute.xlu0 %1083 }
 0x1f2   : > { %v484_v35 = vpop.permute.xlu1 %483 }
 0x1f3   : > { %2737 = vmatprep.subr.msk.mxu1 %vm495_vm1, %v484_v35 }
 0x1f4   : > { %2738 = vmatpush3.xpose.msk.msra.mxu1 %vm495_vm1, %v484_v35 }
 0x1f5   : > { %v3456_v36 = vpop.permute.xlu0 %1302 }
 0x1f6   : > { %v482_v37 = vpop.permute.xlu1 %481 }
 0x1f7   : > { %2739 = vmatprep.subr.msk.mxu1 %vm495_vm1, %v482_v37 }
 0x1f8   : > { %2740 = vmatpush3.xpose.msk.msra.mxu1 %vm495_vm1, %v482_v37 }
 0x1f9   : > { %v3460_v38 = vpop.permute.xlu0 %1097 }
 0x1fa   : > { %v480_v39 = vpop.permute.xlu1 %479  ;;  %2811 = vmatprep.subr.mxu0 %v3460_v38 }
 0x1fb   : > { %2741 = vmatprep.subr.msk.mxu1 %vm495_vm1, %v480_v39 }
 0x1fc   : > { %2742 = vmatpush3.xpose.msk.msra.mxu1 %vm495_vm1, %v480_v39 }
 0x1fd   : > { %2783 = vmatprep.subr.msk.mxu1 %vm495_vm1, %v889_v24 }
 0x1fe   : > { %v887_v40 = vpop.permute.xlu1 %886 }
 0x1ff   : > { %2744 = vmatmul.mubr.msk.f32.vlgmr.msra.gmra.mxu1 %vm495_vm1, %v3396_v19 }
 0x200   : > { %2746 = vmatprep.mubr.msk.f32.mxu1 %vm495_vm1, %v3401_v20  ;;  %2784 = vmatpush3.xpose.msk.msra.mxu1 %vm495_vm1, %v889_v24 }
 0x201   : > { %2785 = vmatprep.subr.msk.mxu1 %vm495_vm1, %v887_v40 }
 0x202   : > { %v885_v42 = vpop.permute.xlu1 %884 }
 0x203   : > { %2747 = vmatmul.mubr.msk.f32.gmra.mxu1 %vm495_vm1, %v3406_v21 }
 0x204   : > { %2749 = vmatprep.mubr.msk.f32.mxu1 %vm495_vm1, %v3314_v9  ;;  %2786 = vmatpush3.xpose.msk.msra.mxu1 %vm495_vm1, %v887_v40 }
 0x205   : > { %2787 = vmatprep.subr.msk.mxu1 %vm495_vm1, %v885_v42 }
 0x206   : > { %v883_v43 = vpop.permute.xlu1 %882 }
 0x207   : > { %2750 = vmatmul.mubr.msk.f32.gmra.mxu1 %vm495_vm1, %v3411_v22 }
 0x208   : > { %2752 = vmatprep.mubr.msk.f32.mxu1 %vm495_vm1, %v3321_v10  ;;  %2788 = vmatpush3.xpose.msk.msra.mxu1 %vm495_vm1, %v885_v42 }
 0x209   : > { %2789 = vmatprep.subr.msk.mxu1 %vm495_vm1, %v883_v43 }
 0x20a   : > { %v881_v45 = vpop.permute.xlu1 %880 }
 0x20b   : > { %2753 = vmatmul.mubr.msk.f32.gmra.mxu1 %vm495_vm1, %v3416_v23 }
 0x20c   : > { %2790 = vmatpush3.xpose.msk.msra.mxu1 %vm495_vm1, %v883_v43 }
 0x20d   : > { %2791 = vmatprep.subr.msk.mxu1 %vm495_vm1, %v881_v45 }
 0x20e   : > { %v879_v47 = vpop.permute.xlu1 %878 }
 0x210   : > { %2792 = vmatpush3.xpose.msk.msra.mxu1 %vm495_vm1, %v881_v45 }
 0x211   : > { %2793 = vmatprep.subr.msk.mxu1 %vm495_vm1, %v879_v47 }
 0x212   : > { %v877_v48 = vpop.permute.xlu1 %876 }
 0x214   : > { %2794 = vmatpush3.xpose.msk.msra.mxu1 %vm495_vm1, %v879_v47 }
 0x215   : > { %2795 = vmatprep.subr.msk.mxu1 %vm495_vm1, %v877_v48 }
 0x216   : > { %v875_v49 = vpop.permute.xlu1 %874 }
 0x218   : > { %2796 = vmatpush3.xpose.msk.msra.mxu1 %vm495_vm1, %v877_v48 }
 0x219   : > { %2797 = vmatprep.subr.msk.mxu1 %vm495_vm1, %v875_v49 }
 0x21a   : > { %v859_v51 = vpop.permute.xlu1 %858 }
 0x21b   : > { %2799 = vmatprep.mubr.msk.f32.mxu1 %vm495_vm1, %v859_v51 }
 0x21c   : > { %2798 = vmatpush3.xpose.msk.msra.mxu1 %vm495_vm1, %v875_v49 }
 0x21e   : > { %v861_v52 = vpop.permute.xlu1 %860 }
 0x21f   : > { %2800 = vmatmul.mubr.msk.f32.vlgmr.msra.gmra.mxu1 %vm495_vm1, %v861_v52 }
 0x222   : > { %v863_v53 = vpop.permute.xlu1 %862 }
 0x223   : > { %2802 = vmatprep.mubr.msk.f32.mxu1 %vm495_vm1, %v863_v53 }
 0x226   : > { %v865_v55 = vpop.permute.xlu1 %864 }
 0x227   : > { %2803 = vmatmul.mubr.msk.f32.gmra.mxu1 %vm495_vm1, %v865_v55 }
 0x228   : > { %2805 = vmatprep.mubr.msk.f32.mxu1 %vm495_vm1, %v3436_v26 }
 0x22a   : > { %v869_v56 = vpop.permute.xlu1 %868 }
 0x22b   : > { %2806 = vmatmul.mubr.msk.f32.gmra.mxu1 %vm495_vm1, %v869_v56 }
 0x22c   : > { %2808 = vmatprep.mubr.msk.f32.mxu1 %vm495_vm1, %v3440_v28 }
 0x22e   : > { %v873_v57 = vpop.permute.xlu1 %872 }
 0x22f   : > { %2809 = vmatmul.mubr.msk.f32.gmra.mxu1 %vm495_vm1, %v873_v57 }
 0x232   : > { %v1096_v52 = vpop.permute.xlu1 %1095 }
 0x236   : > { %v3569_v53 = vpop.permute.xlu1 %1093 }
 0x23a   : > { %v3573_v55 = vpop.permute.xlu1 %1089 }
 0x23e   : > { %v3575_v56 = vpop.permute.xlu1 %1085 }
 0x242   : > { %v3579_v57 = vpop.permute.xlu1 %1306 }
 0x2bf   : > { %v3505_v59 = vpop.f32.mrf.mxu1 }
 0x2c0   : > { %v644_v60 = vsel %vm293_vm0, %v3505_v59, -inf }
 0x2c1   : > { %v3509_v61 = vpop.f32.mrf.mxu1  ;;  %645 = vmax.xlane.f32.xlu1 %v644_v60  ;;  %v3585_v60 = vpop.permute.xlu1 %1304 }
 0x2c2   : > { %v641_v63 = vsel %vm293_vm0, %v3509_v61, -inf }
 0x2c3   : > { %642 = vmax.xlane.f32.xlu0 %v641_v63  ;;  %v3513_v0 = vpop.f32.mrf.mxu1 }
 0x2c4   : > { %v650_v3 = vsel %vm293_vm0, %v3513_v0, -inf }
 0x2c5   : > { %v3515_v1 = vpop.f32.mrf.mxu1  ;;  %v3589_v63 = vpop.permute.xlu1 %1300 }
 0x2c6   : > { %v647_v8 = vsel %vm293_vm0, %v3515_v1, -inf }
 0x2c7   : > { %651 = vmax.xlane.f32.xlu0 %v650_v3  ;;  %v3519_v4 = vpop.f32.mrf.mxu1 }
 0x2c8   : > { %v656_v5 = vsel %vm293_vm0, %v3519_v4, -inf }
 0x2c9   : > { %v3523_v7 = vpop.f32.mrf.mxu1  ;;  %657 = vmax.xlane.f32.xlu1 %v656_v5 }
 0x2ca   : > { %v653_v26 = vsel %vm293_vm0, %v3523_v7, -inf }
 0x2cb   : > { %648 = vmax.xlane.f32.xlu0 %v647_v8  ;;  %v3527_v24 = vpop.f32.mrf.mxu1 }
 0x2cc   : > { %v662_v25 = vsel %vm293_vm0, %v3527_v24, -inf }
 0x2cd   : > { %663 = vmax.xlane.f32.xlu1 %v662_v25  ;;  %v3533_v27 = vpop.f32.mrf.mxu1 }
 0x2ce   : > { %v659_v28 = vsel %vm293_vm0, %v3533_v27, -inf }
 0x2cf   : > { %654 = vmax.xlane.f32.xlu0 %v653_v26 }
 0x2d3   : > { %660 = vmax.xlane.f32.xlu0 %v659_v28 }
 0x2df   : > { %v3537_v29 = vpop.f32.mrf.mxu1 }
 0x2e0   : > { %v1030_v31 = vsel %vm293_vm0, %v3537_v29, -inf }
 0x2e1   : > { %1031 = vmax.xlane.f32.xlu1 %v1030_v31  ;;  %v3541_v33 = vpop.f32.mrf.mxu1 }
 0x2e2   : > { %v1027_v35 = vsel %vm293_vm0, %v3541_v33, -inf }
 0x2e3   : > { %1028 = vmax.xlane.f32.xlu0 %v1027_v35 }
 0x2e7   : > { %v3549_v37 = vpop.f32.mrf.mxu1 }
 0x2e8   : > { %v1036_v45 = vsel %vm293_vm0, %v3549_v37, -inf }
 0x2e9   : > { %v3551_v39 = vpop.f32.mrf.mxu1 }
 0x2ea   : > { %v1033_v42 = vsel %vm293_vm0, %v3551_v39, -inf }
 0x2eb   : > { %v3553_v40 = vpop.f32.mrf.mxu1 }
 0x2ec   : > { %v1042_v48 = vsel %vm293_vm0, %v3553_v40, -inf }
 0x2ed   : > { %v3557_v43 = vpop.f32.mrf.mxu1 }
 0x2ee   : > { %v1039_v47 = vsel %vm293_vm0, %v3557_v43, -inf }
 0x2ef   : > { %v3565_v49 = vpop.f32.mrf.mxu1 }
 0x2f0   : > { %v1048_v51 = vsel %vm293_vm0, %v3565_v49, -inf }
 0x2f1   : > { %v3595_v5 = vpop.f32.mrf.mxu1 }
 0x2f2   : > { %1296 = vrot.lane.b32.xlu1 %v3291_v50, %s3153_s14  ;;  %v1045_v31 = vsel %vm293_vm0, %v3595_v5, -inf }
 0x2f9   : > { %1298 = vrot.lane.b32.xlu0 %v3294_v54, %s3153_s14 }
 0x316   : > { %1034 = vmax.xlane.f32.xlu1 %v1033_v42 }
 0x318   : > { %1037 = vmax.xlane.f32.xlu0 %v1036_v45 }
 0x31a   : > { %1040 = vmax.xlane.f32.xlu1 %v1039_v47 }
 0x31c   : > { %1043 = vmax.xlane.f32.xlu0 %v1042_v48 }
 0x320   : > { %1049 = vmax.xlane.f32.xlu0 %v1048_v51 }
 0x32b   : > { %1292 = vrot.lane.b32.xlu1 %v3280_v41, %s3153_s14 }
 0x336   : > { %1294 = vrot.lane.b32.xlu0 %v3286_v46, %s3153_s14 }
 0x33a   : > { %1276 = vrot.lane.b32.xlu0 %v3283_v44, %s3154_s15 }
 0x33e   : > { %1280 = vrot.lane.b32.xlu0 %v3401_v20, %s3154_s15 }
 0x342   : > { %1284 = vrot.lane.b32.xlu0 %v3314_v9, %s3154_s15 }
 0x346   : > { %1288 = vrot.lane.b32.xlu0 %v3321_v10, %s3154_s15 }
 0x34a   : > { %v646_v3 = vpop.xlane.xlu1 %645  ;;  %1507 = vrot.lane.b32.xlu0 %v3327_v11, %s3154_s15 }
 0x34b   : > { %v666_v8 = vsub.f32 %v3505_v59, %v646_v3 }
 0x34c   : > { %v643_v25 = vpop.xlane.xlu0 %642 }
 0x34d   : > { %v665_v26 = vsub.f32 %v3509_v61, %v643_v25  ;;  %v675_v28 = vmul.f32 1.442695, %v666_v8 }
 0x34e   : > { %1503 = vrot.lane.b32.xlu0 %v3339_v14, %s3154_s15 }
 0x34f   : > { %v673_v35 = vmul.f32 1.442695, %v665_v26  ;;  %1046 = vmax.xlane.f32.xlu1 %v1045_v31 }
 0x350   : > { %v652_v42 = vpop.xlane.xlu0 %651 }
 0x351   : > { %3011 = vpow2.f32 %v673_v35  ;;  %v668_v45 = vsub.f32 %v3513_v0, %v652_v42 }
 0x352   : > { %3013 = vpow2.f32 %v675_v28  ;;  %v658_v47 = vpop.xlane.xlu1 %657  ;;  %1501 = vrot.lane.b32.xlu0 %v3333_v13, %s3154_s15 }
 0x353   : > { %v679_v48 = vmul.f32 1.442695, %v668_v45  ;;  %v670_v51 = vsub.f32 %v3519_v4, %v658_v47 }
 0x354   : > { %v649_v59 = vpop.xlane.xlu0 %648 }
 0x355   : > { %v667_v61 = vsub.f32 %v3515_v1, %v649_v59  ;;  %v683_v0 = vmul.f32 1.442695, %v670_v51 }
 0x356   : > { %1497 = vrot.lane.b32.xlu0 %v3345_v15, %s3154_s15  ;;  %v664_v8 = vpop.xlane.xlu1 %663 }
 0x357   : > { %v677_v3 = vmul.f32 1.442695, %v667_v61  ;;  %v672_v28 = vsub.f32 %v3527_v24, %v664_v8 }
 0x358   : > { %v655_v25 = vpop.xlane.xlu0 %654 }
 0x359   : > { %3015 = vpow2.f32 %v677_v3  ;;  %v669_v26 = vsub.f32 %v3523_v7, %v655_v25  ;;  %v687_v42 = vmul.f32 1.442695, %v672_v28 }
 0x35a   : > { %3017 = vpow2.f32 %v679_v48  ;;  %1493 = vrot.lane.b32.xlu0 %v3357_v17, %s3154_s15 }
 0x35b   : > { %v681_v1 = vmul.f32 1.442695, %v669_v26 }
 0x35c   : > { %v661_v31 = vpop.xlane.xlu0 %660 }
 0x35d   : > { %3019 = vpow2.f32 %v681_v1  ;;  %v671_v4 = vsub.f32 %v3533_v27, %v661_v31 }
 0x35e   : > { %v3615_v35 = vpop.eup %3011  ;;  %3021 = vpow2.f32 %v683_v0  ;;  %1712 = vrot.lane.b32.xlu0 %v3300_v62, %s3155_s16 }
 0x35f   : > { %v3619_v7 = vpop.eup %3013  ;;  %v685_v45 = vmul.f32 1.442695, %v671_v4  ;;  %2771 = vmatprep.mubr.msk.f32.mxu0 %vm293_vm0, %v3615_v35 }
 0x360   : > { %2772 = vmatmul.mubr.msk.f32.vlgmr.msra.gmra.mxu0 %vm293_vm0, %v3619_v7  ;;  %1278 = vrot.lane.b32.xlu1 %v3396_v19, %s3154_s15 }
 0x361   : > { %3023 = vpow2.f32 %v685_v45  ;;  %2812 = vmatpush3.msra.mxu0 %v3460_v38 }
 0x362   : > { %3025 = vpow2.f32 %v687_v42  ;;  %2813 = vmatprep.subr.mxu0 %v1096_v52 }
 0x363   : > { %2814 = vmatpush3.msra.mxu0 %v1096_v52 }
 0x364   : > { %2815 = vmatprep.subr.mxu0 %v3569_v53  ;;  %1282 = vrot.lane.b32.xlu1 %v3406_v21, %s3154_s15 }
 0x365   : > { %2816 = vmatpush3.msra.mxu0 %v3569_v53 }
 0x366   : > { %v3632_v62 = vpop.eup %3015  ;;  %2817 = vmatprep.subr.mxu0 %v3444_v30 }
 0x367   : > { %v3635_v17 = vpop.eup %3017  ;;  %2818 = vmatpush3.msra.mxu0 %v3444_v30  ;;  %2774 = vmatprep.mubr.msk.f32.mxu0 %vm293_vm0, %v3632_v62 }
 0x368   : > { %2819 = vmatprep.subr.mxu0 %v3573_v55  ;;  %2775 = vmatmul.mubr.msk.f32.gmra.mxu0 %vm293_vm0, %v3635_v17 }
 0x369   : > { %2820 = vmatpush3.msra.mxu0 %v3573_v55  ;;  %1286 = vrot.lane.b32.xlu1 %v3411_v22, %s3154_s15 }
 0x36a   : > { %v3646_v38 = vpop.eup %3019  ;;  %2821 = vmatprep.subr.mxu0 %v3448_v32  ;;  %v1032_v24 = vpop.xlane.xlu1 %1031 }
 0x36b   : > { %v3649_v27 = vpop.eup %3021  ;;  %2822 = vmatpush3.msra.mxu0 %v3448_v32  ;;  %v1052_v30 = vsub.f32 %v3537_v29, %v1032_v24  ;;  %2777 = vmatprep.mubr.msk.f32.mxu0 %vm293_vm0, %v3646_v38 }
 0x36c   : > { %2823 = vmatprep.subr.mxu0 %v3575_v56  ;;  %2778 = vmatmul.mubr.msk.f32.gmra.mxu0 %vm293_vm0, %v3649_v27  ;;  %v1029_v52 = vpop.xlane.xlu0 %1028 }
 0x36d   : > { %2824 = vmatpush3.msra.mxu0 %v3575_v56  ;;  %1290 = vrot.lane.b32.xlu1 %v3416_v23, %s3154_s15  ;;  %v1051_v53 = vsub.f32 %v3541_v33, %v1029_v52  ;;  %v1061_v32 = vmul.f32 1.442695, %v1052_v30 }
 0x36e   : > { %v3662_v55 = vpop.eup %3023  ;;  %2825 = vmatprep.subr.mxu0 %v3452_v34 }
 0x36f   : > { %v3665_v29 = vpop.eup %3025  ;;  %v1059_v47 = vmul.f32 1.442695, %v1051_v53  ;;  %2826 = vmatpush3.msra.mxu0 %v3452_v34  ;;  %2780 = vmatprep.mubr.msk.f32.mxu0 %vm293_vm0, %v3662_v55 }
 0x370   : > { %2839 = vmatprep.subr.msk.mxu0 %vm495_vm1, %v3579_v57  ;;  %2781 = vmatmul.mubr.msk.f32.gmra.mxu0 %vm293_vm0, %v3665_v29 }
 0x371   : > { %3027 = vpow2.f32 %v1059_v47  ;;  %1505 = vrot.lane.b32.xlu1 %v3331_v12, %s3154_s15 }
 0x372   : > { %3029 = vpow2.f32 %v1061_v32 }
 0x375   : > { %1499 = vrot.lane.b32.xlu1 %v3351_v16, %s3154_s15 }
 0x379   : > { %1495 = vrot.lane.b32.xlu1 %v3363_v18, %s3154_s15 }
 0x37d   : > { %1716 = vrot.lane.b32.xlu1 %v3306_v6, %s3155_s16  ;;  %v1297_v6 = vpop.permute.xlu1 %1296 }
 0x37e   : > { %v3682_v34 = vpop.eup %3027 }
 0x37f   : > { %v3684_v33 = vpop.eup %3029  ;;  %2827 = vmatprep.mubr.msk.f32.mxu0 %vm293_vm0, %v3682_v34 }
 0x380   : > { %2828 = vmatmul.mubr.msk.f32.vlgmr.msra.gmra.mxu0 %vm293_vm0, %v3684_v33 }
 0x381   : > { %1714 = vrot.lane.b32.xlu1 %v3303_v2, %s3155_s16  ;;  %2840 = vmatpush3.xpose.msk.msra.mxu0 %vm495_vm1, %v3579_v57  ;;  %v1299_v2 = vpop.permute.xlu0 %1298 }
 0x382   : > { %2841 = vmatprep.subr.msk.mxu0 %vm495_vm1, %v3585_v60 }
 0x385   : > { %1710 = vrot.lane.b32.xlu1 %v3297_v58, %s3155_s16  ;;  %2842 = vmatpush3.xpose.msk.msra.mxu0 %vm495_vm1, %v3585_v60 }
 0x386   : > { %2843 = vmatprep.subr.msk.mxu0 %vm495_vm1, %v3456_v36 }
 0x389   : > { %2844 = vmatpush3.xpose.msk.msra.mxu0 %vm495_vm1, %v3456_v36 }
 0x38a   : > { %2845 = vmatprep.subr.msk.mxu0 %vm495_vm1, %v3589_v63 }
 0x38d   : > { %2846 = vmatpush3.xpose.msk.msra.mxu0 %vm495_vm1, %v3589_v63 }
 0x38e   : > { %2847 = vmatprep.subr.msk.mxu0 %vm495_vm1, %v1299_v2 }
 0x391   : > { %2848 = vmatpush3.xpose.msk.msra.mxu0 %vm495_vm1, %v1299_v2 }
 0x392   : > { %2849 = vmatprep.subr.msk.mxu0 %vm495_vm1, %v1297_v6 }
 0x395   : > { %2850 = vmatpush3.xpose.msk.msra.mxu0 %vm495_vm1, %v1297_v6 }
 0x39f   : > { %v1035_v58 = vpop.xlane.xlu1 %1034 }
 0x3a0   : > { %v1053_v18 = vsub.f32 %v3551_v39, %v1035_v58 }
 0x3a1   : > { %v1038_v36 = vpop.xlane.xlu0 %1037 }
 0x3a2   : > { %v1063_v56 = vmul.f32 1.442695, %v1053_v18  ;;  %v1054_v57 = vsub.f32 %v3549_v37, %v1038_v36 }
 0x3a3   : > { %v1041_v60 = vpop.xlane.xlu1 %1040 }
 0x3a4   : > { %3031 = vpow2.f32 %v1063_v56  ;;  %v1065_v59 = vmul.f32 1.442695, %v1054_v57  ;;  %v1055_v63 = vsub.f32 %v3557_v43, %v1041_v60 }
 0x3a5   : > { %v1044_v61 = vpop.xlane.xlu0 %1043 }
 0x3a6   : > { %3033 = vpow2.f32 %v1065_v59  ;;  %v1067_v48 = vmul.f32 1.442695, %v1055_v63  ;;  %v1056_v51 = vsub.f32 %v3553_v40, %v1044_v61 }
 0x3a7   : > { %v1293_v39 = vpop.permute.xlu1 %1292 }
 0x3a8   : > { %3035 = vpow2.f32 %v1067_v48  ;;  %v1069_v3 = vmul.f32 1.442695, %v1056_v51 }
 0x3a9   : > { %v1050_v8 = vpop.xlane.xlu0 %1049 }
 0x3aa   : > { %3037 = vpow2.f32 %v1069_v3  ;;  %v1058_v42 = vsub.f32 %v3565_v49, %v1050_v8 }
 0x3ac   : > { %v1073_v30 = vmul.f32 1.442695, %v1058_v42 }
 0x3ad   : > { %v1295_v25 = vpop.permute.xlu0 %1294 }
 0x3ae   : > { %2851 = vmatprep.subr.msk.mxu0 %vm495_vm1, %v1295_v25 }
 0x3af   : > { %2852 = vmatpush3.xpose.msk.msra.mxu0 %vm495_vm1, %v1295_v25 }
 0x3b0   : > { %2853 = vmatprep.subr.msk.mxu0 %vm495_vm1, %v1293_v39 }
 0x3b1   : > { %v3719_v37 = vpop.eup %3031  ;;  %v1277_v43 = vpop.permute.xlu0 %1276 }
 0x3b2   : > { %2830 = vmatprep.mubr.msk.f32.mxu0 %vm293_vm0, %v3719_v37 }
 0x3b3   : > { %v3723_v26 = vpop.eup %3033  ;;  %2854 = vmatpush3.xpose.msk.msra.mxu0 %vm495_vm1, %v1293_v39 }
 0x3b4   : > { %2831 = vmatmul.mubr.msk.f32.gmra.mxu0 %vm293_vm0, %v3723_v26 }
 0x3b5   : > { %v3728_v40 = vpop.eup %3035  ;;  %v1281_v0 = vpop.permute.xlu0 %1280 }
 0x3b6   : > { %2833 = vmatprep.mubr.msk.f32.mxu0 %vm293_vm0, %v3728_v40 }
 0x3b7   : > { %v3732_v28 = vpop.eup %3037 }
 0x3b8   : > { %2834 = vmatmul.mubr.msk.f32.gmra.mxu0 %vm293_vm0, %v3732_v28 }
 0x3b9   : > { %v1285_v1 = vpop.permute.xlu0 %1284 }
 0x3bd   : > { %v1289_v31 = vpop.permute.xlu0 %1288 }
 0x3c1   : > { %v1508_v4 = vpop.permute.xlu0 %1507 }
 0x3c2   : > { %2867 = vmatprep.subr.mxu1 %v1508_v4 }
 0x3c3   : > { %2868 = vmatpush3.msra.mxu1 %v1508_v4 }
 0x3c5   : > { %v1504_v2 = vpop.permute.xlu0 %1503 }
 0x3c9   : > { %v1502_v49 = vpop.permute.xlu0 %1501 }
 0x3cd   : > { %v1498_v56 = vpop.permute.xlu0 %1497 }
 0x3d1   : > { %v1494_v60 = vpop.permute.xlu0 %1493 }
 0x3d8   : > { %v1047_v45 = vpop.xlane.xlu1 %1046 }
 0x3d9   : > { %v1057_v24 = vsub.f32 %v3595_v5, %v1047_v45 }
 0x3db   : > { %v1071_v52 = vmul.f32 1.442695, %v1057_v24 }
 0x3dc   : > { %v1279_v53 = vpop.permute.xlu1 %1278 }
 0x3dd   : > { %3039 = vpow2.f32 %v1071_v52 }
 0x3de   : > { %3041 = vpow2.f32 %v1073_v30 }
 0x3e0   : > { %v1283_v32 = vpop.permute.xlu1 %1282 }
 0x3e4   : > { %v1287_v47 = vpop.permute.xlu1 %1286 }
 0x3e8   : > { %v1291_v6 = vpop.permute.xlu1 %1290 }
 0x3ea   : > { %v3738_v58 = vpop.eup %3039 }
 0x3eb   : > { %v3740_v18 = vpop.eup %3041  ;;  %2836 = vmatprep.mubr.msk.f32.mxu0 %vm293_vm0, %v3738_v58 }
 0x3ec   : > { %v1506_v36 = vpop.permute.xlu1 %1505  ;;  %2837 = vmatmul.mubr.msk.f32.gmra.mxu0 %vm293_vm0, %v3740_v18 }
 0x3ed   : > { %2855 = vmatprep.mubr.msk.f32.mxu0 %vm495_vm1, %v1277_v43  ;;  %2869 = vmatprep.subr.mxu1 %v1506_v36 }
 0x3ee   : > { %2870 = vmatpush3.msra.mxu1 %v1506_v36 }
 0x3ef   : > { %2871 = vmatprep.subr.mxu1 %v1504_v2 }
 0x3f0   : > { %v1500_v5 = vpop.permute.xlu1 %1499  ;;  %2856 = vmatmul.mubr.msk.f32.vlgmr.msra.gmra.mxu0 %vm495_vm1, %v1279_v53  ;;  %2872 = vmatpush3.msra.mxu1 %v1504_v2 }
 0x3f1   : > { %2858 = vmatprep.mubr.msk.f32.mxu0 %vm495_vm1, %v1281_v0  ;;  %2873 = vmatprep.subr.mxu1 %v1502_v49 }
 0x3f2   : > { %2874 = vmatpush3.msra.mxu1 %v1502_v49 }
 0x3f3   : > { %2875 = vmatprep.subr.mxu1 %v1500_v5 }
 0x3f4   : > { %v1496_v57 = vpop.permute.xlu1 %1495  ;;  %2859 = vmatmul.mubr.msk.f32.gmra.mxu0 %vm495_vm1, %v1283_v32  ;;  %2876 = vmatpush3.msra.mxu1 %v1500_v5 }
 0x3f5   : > { %2861 = vmatprep.mubr.msk.f32.mxu0 %vm495_vm1, %v1285_v1  ;;  %2877 = vmatprep.subr.mxu1 %v1498_v56 }
 0x3f6   : > { %2878 = vmatpush3.msra.mxu1 %v1498_v56 }
 0x3f7   : > { %2879 = vmatprep.subr.mxu1 %v1496_v57 }
 0x3f8   : > { %2862 = vmatmul.mubr.msk.f32.gmra.mxu0 %vm495_vm1, %v1287_v47  ;;  %2880 = vmatpush3.msra.mxu1 %v1496_v57  ;;  %v3753_v59 = vpop.permute.xlu1 %1716 }
 0x3f9   : > { %2864 = vmatprep.mubr.msk.f32.mxu0 %vm495_vm1, %v1289_v31  ;;  %2881 = vmatprep.subr.mxu1 %v1494_v60 }
 0x3fa   : > { %2882 = vmatpush3.msra.mxu1 %v1494_v60 }
 0x3fb   : > { %2895 = vmatprep.subr.msk.mxu1 %vm495_vm1, %v3753_v59 }
 0x3fc   : > { %2865 = vmatmul.mubr.msk.f32.gmra.mxu0 %vm495_vm1, %v1291_v6 }
 0x420   : > { %v3758_v63 = vpop.f32.mrf.mxu0 }
 0x422   : > { %v3760_v61 = vpop.f32.mrf.mxu0 }
 0x428   : > { %v3762_v48 = vpop.f32.mrf.mxu0 }
 0x42a   : > { %v3764_v51 = vpop.f32.mrf.mxu0 }
 0x42c   : > { %v3766_v3 = vpop.f32.mrf.mxu0 }
 0x42e   : > { %v3768_v8 = vpop.f32.mrf.mxu0 }
 0x430   : > { %v3770_v25 = vpop.f32.mrf.mxu0 }
 0x432   : > { %v3772_v39 = vpop.f32.mrf.mxu0 }
 0x440   : > { %v3774_v43 = vpop.f32.mrf.mxu0 }
 0x442   : > { %v3776_v0 = vpop.f32.mrf.mxu0 }
 0x474   : > { %v3778_v1 = vpop.f32.mrf.mxu0 }
 0x476   : > { %v3780_v31 = vpop.f32.mrf.mxu0 }
 0x478   : > { %v3782_v4 = vpop.f32.mrf.mxu0 }
 0x47a   : > { %v3784_v42 = vpop.f32.mrf.mxu0 }
 0x4ac   : > { %v3786_v45 = vpop.f32.mrf.mxu0 }
 0x4ae   : > { %v3788_v24 = vpop.f32.mrf.mxu0 }
 0x4b0   : > { %v2857_v30 = vpop.f32.mrf.mxu0 }
 0x4b1   : > { %v1448_v52 = vsel %vm293_vm0, %v2857_v30, -inf }
 0x4b2   : > { %1449 = vmax.xlane.f32.xlu1 %v1448_v52  ;;  %v1406_v53 = vpop.f32.mrf.mxu0 }
 0x4b3   : > { %v1445_v32 = vsel %vm293_vm0, %v1406_v53, -inf }
 0x4b4   : > { %1446 = vmax.xlane.f32.xlu0 %v1445_v32  ;;  %v3796_v47 = vpop.f32.mrf.mxu0 }
 0x4b5   : > { %v1454_v5 = vsel %vm293_vm0, %v3796_v47, -inf }
 0x4b6   : > { %v3798_v2 = vpop.f32.mrf.mxu0 }
 0x4b7   : > { %v1451_v49 = vsel %vm293_vm0, %v3798_v2, -inf }
 0x4b8   : > { %v3800_v6 = vpop.f32.mrf.mxu0 }
 0x4ba   : > { %v3804_v36 = vpop.f32.mrf.mxu0 }
 0x4bc   : > { %v3812_v56 = vpop.f32.mrf.mxu0 }
 0x4bd   : > { %v1466_v57 = vsel %vm293_vm0, %v3812_v56, -inf }
 0x4c3   : > { %1706 = vrot.lane.b32.xlu1 %v3291_v50, %s3155_s16  ;;  %v1457_v50 = vsel %vm293_vm0, %v3804_v36, -inf }
 0x4ca   : > { %1708 = vrot.lane.b32.xlu0 %v3294_v54, %s3155_s16  ;;  %v1460_v54 = vsel %vm293_vm0, %v3800_v6, -inf }
 0x4e7   : > { %1452 = vmax.xlane.f32.xlu1 %v1451_v49 }
 0x4e9   : > { %1455 = vmax.xlane.f32.xlu0 %v1454_v5 }
 0x4eb   : > { %1458 = vmax.xlane.f32.xlu1 %v1457_v50 }
 0x4ed   : > { %1461 = vmax.xlane.f32.xlu0 %v1460_v54 }
 0x4f1   : > { %1467 = vmax.xlane.f32.xlu0 %v1466_v57 }
 0x4fc   : > { %1702 = vrot.lane.b32.xlu1 %v3280_v41, %s3155_s16  ;;  %v3830_v41 = vpop.f32.mrf.mxu0 }
 0x507   : > { %1704 = vrot.lane.b32.xlu0 %v3286_v46, %s3155_s16  ;;  %v1715_v46 = vpop.permute.xlu1 %1714 }
 0x50b   : > { %1686 = vrot.lane.b32.xlu0 %v3283_v44, %s3156_s17  ;;  %v1463_v44 = vsel %vm293_vm0, %v3830_v41, -inf }
 0x50f   : > { %1690 = vrot.lane.b32.xlu0 %v3401_v20, %s3156_s17 }
 0x513   : > { %1694 = vrot.lane.b32.xlu0 %v3314_v9, %s3156_s17  ;;  %v1711_v9 = vpop.permute.xlu1 %1710 }
 0x517   : > { %1698 = vrot.lane.b32.xlu0 %v3321_v10, %s3156_s17  ;;  %v1713_v10 = vpop.permute.xlu0 %1712 }
 0x51b   : > { %1917 = vrot.lane.b32.xlu0 %v3327_v11, %s3156_s17 }
 0x51f   : > { %1909 = vrot.lane.b32.xlu0 %v3351_v16, %s3156_s17 }
 0x520   : > { %1464 = vmax.xlane.f32.xlu1 %v1463_v44 }
 0x531   : > { %1688 = vrot.lane.b32.xlu1 %v3396_v19, %s3156_s17 }
 0x535   : > { %1692 = vrot.lane.b32.xlu1 %v3406_v21, %s3156_s17 }
 0x539   : > { %1696 = vrot.lane.b32.xlu1 %v3411_v22, %s3156_s17 }
 0x53b   : > { %v1450_v11 = vpop.xlane.xlu1 %1449 }
 0x53c   : > { %v1470_v20 = vsub.f32 %v2857_v30, %v1450_v11 }
 0x53d   : > { %1700 = vrot.lane.b32.xlu1 %v3416_v23, %s3156_s17  ;;  %v1447_v16 = vpop.xlane.xlu0 %1446 }
 0x53e   : > { %v1469_v60 = vsub.f32 %v1406_v53, %v1447_v16  ;;  %v1479_v52 = vmul.f32 1.442695, %v1470_v20 }
 0x540   : > { %v1477_v32 = vmul.f32 1.442695, %v1469_v60 }
 0x541   : > { %1915 = vrot.lane.b32.xlu1 %v3331_v12, %s3156_s17  ;;  %v1709_v12 = vpop.permute.xlu0 %1708 }
 0x542   : > { %3043 = vpow2.f32 %v1477_v32 }
 0x543   : > { %3045 = vpow2.f32 %v1479_v52 }
 0x545   : > { %1913 = vrot.lane.b32.xlu1 %v3339_v14, %s3156_s17 }
 0x549   : > { %1911 = vrot.lane.b32.xlu1 %v3333_v13, %s3156_s17  ;;  %v1707_v13 = vpop.permute.xlu1 %1706 }
 0x54d   : > { %1907 = vrot.lane.b32.xlu1 %v3345_v15, %s3156_s17 }
 0x54f   : > { %v3852_v19 = vpop.eup %3043 }
 0x550   : > { %v3854_v21 = vpop.eup %3045  ;;  %2883 = vmatprep.mubr.msk.f32.mxu1 %vm293_vm0, %v3852_v19 }
 0x551   : > { %2884 = vmatmul.mubr.msk.f32.vlgmr.msra.gmra.mxu1 %vm293_vm0, %v3854_v21 }
 0x552   : > { %2896 = vmatpush3.xpose.msk.msra.mxu1 %vm495_vm1, %v3753_v59 }
 0x553   : > { %2897 = vmatprep.subr.msk.mxu1 %vm495_vm1, %v1715_v46 }
 0x556   : > { %2898 = vmatpush3.xpose.msk.msra.mxu1 %vm495_vm1, %v1715_v46 }
 0x557   : > { %2899 = vmatprep.subr.msk.mxu1 %vm495_vm1, %v1713_v10 }
 0x55a   : > { %2900 = vmatpush3.xpose.msk.msra.mxu1 %vm495_vm1, %v1713_v10 }
 0x55b   : > { %2901 = vmatprep.subr.msk.mxu1 %vm495_vm1, %v1711_v9 }
 0x55e   : > { %2902 = vmatpush3.xpose.msk.msra.mxu1 %vm495_vm1, %v1711_v9 }
 0x55f   : > { %2903 = vmatprep.subr.msk.mxu1 %vm495_vm1, %v1709_v12 }
 0x562   : > { %2904 = vmatpush3.xpose.msk.msra.mxu1 %vm495_vm1, %v1709_v12 }
 0x563   : > { %2905 = vmatprep.subr.msk.mxu1 %vm495_vm1, %v1707_v13 }
 0x566   : > { %2906 = vmatpush3.xpose.msk.msra.mxu1 %vm495_vm1, %v1707_v13 }
 0x570   : > { %v1453_v14 = vpop.xlane.xlu1 %1452 }
 0x571   : > { %v1471_v15 = vsub.f32 %v3798_v2, %v1453_v14 }
 0x572   : > { %v1456_v22 = vpop.xlane.xlu0 %1455 }
 0x573   : > { %v1481_v23 = vmul.f32 1.442695, %v1471_v15  ;;  %v1472_v59 = vsub.f32 %v3796_v47, %v1456_v22 }
 0x574   : > { %v1459_v30 = vpop.xlane.xlu1 %1458 }
 0x575   : > { %3047 = vpow2.f32 %v1481_v23  ;;  %v1483_v53 = vmul.f32 1.442695, %v1472_v59  ;;  %v1473_v49 = vsub.f32 %v3804_v36, %v1459_v30 }
 0x576   : > { %v1462_v5 = vpop.xlane.xlu0 %1461 }
 0x577   : > { %3049 = vpow2.f32 %v1483_v53  ;;  %v1485_v50 = vmul.f32 1.442695, %v1473_v49  ;;  %v1474_v54 = vsub.f32 %v3800_v6, %v1462_v5 }
 0x578   : > { %v1703_v2 = vpop.permute.xlu1 %1702 }
 0x579   : > { %3051 = vpow2.f32 %v1485_v50  ;;  %v1487_v57 = vmul.f32 1.442695, %v1474_v54 }
 0x57a   : > { %v1468_v44 = vpop.xlane.xlu0 %1467 }
 0x57b   : > { %3053 = vpow2.f32 %v1487_v57  ;;  %v1476_v52 = vsub.f32 %v3812_v56, %v1468_v44 }
 0x57d   : > { %v1491_v13 = vmul.f32 1.442695, %v1476_v52 }
 0x57e   : > { %v1705_v46 = vpop.permute.xlu0 %1704 }
 0x57f   : > { %2907 = vmatprep.subr.msk.mxu1 %vm495_vm1, %v1705_v46 }
 0x580   : > { %2908 = vmatpush3.xpose.msk.msra.mxu1 %vm495_vm1, %v1705_v46 }
 0x581   : > { %2909 = vmatprep.subr.msk.mxu1 %vm495_vm1, %v1703_v2 }
 0x582   : > { %v3879_v47 = vpop.eup %3047  ;;  %v1687_v36 = vpop.permute.xlu0 %1686 }
 0x583   : > { %2886 = vmatprep.mubr.msk.f32.mxu1 %vm293_vm0, %v3879_v47 }
 0x584   : > { %v3883_v9 = vpop.eup %3049  ;;  %2910 = vmatpush3.xpose.msk.msra.mxu1 %vm495_vm1, %v1703_v2 }
 0x585   : > { %2887 = vmatmul.mubr.msk.f32.gmra.mxu1 %vm293_vm0, %v3883_v9 }
 0x586   : > { %v3888_v6 = vpop.eup %3051  ;;  %v1691_v10 = vpop.permute.xlu0 %1690 }
 0x587   : > { %2889 = vmatprep.mubr.msk.f32.mxu1 %vm293_vm0, %v3888_v6 }
 0x588   : > { %v3892_v11 = vpop.eup %3053 }
 0x589   : > { %2890 = vmatmul.mubr.msk.f32.gmra.mxu1 %vm293_vm0, %v3892_v11 }
 0x58a   : > { %v1695_v20 = vpop.permute.xlu0 %1694 }
 0x58e   : > { %v1699_v16 = vpop.permute.xlu0 %1698 }
 0x592   : > { %v1918_v60 = vpop.permute.xlu0 %1917 }
 0x593   : > { %2923 = vmatprep.subr.mxu0 %v1918_v60 }
 0x594   : > { %2924 = vmatpush3.msra.mxu0 %v1918_v60 }
 0x596   : > { %v1910_v5 = vpop.permute.xlu0 %1909 }
 0x5a9   : > { %v1465_v32 = vpop.xlane.xlu1 %1464 }
 0x5aa   : > { %v1475_v12 = vsub.f32 %v3830_v41, %v1465_v32 }
 0x5ac   : > { %v1489_v14 = vmul.f32 1.442695, %v1475_v12 }
 0x5ad   : > { %v1689_v15 = vpop.permute.xlu1 %1688 }
 0x5ae   : > { %3055 = vpow2.f32 %v1489_v14 }
 0x5af   : > { %3057 = vpow2.f32 %v1491_v13 }
 0x5b1   : > { %v1693_v22 = vpop.permute.xlu1 %1692 }
 0x5b5   : > { %v1697_v23 = vpop.permute.xlu1 %1696 }
 0x5b9   : > { %v1701_v59 = vpop.permute.xlu1 %1700 }
 0x5bb   : > { %v3898_v30 = vpop.eup %3055 }
 0x5bc   : > { %v3900_v53 = vpop.eup %3057  ;;  %2892 = vmatprep.mubr.msk.f32.mxu1 %vm293_vm0, %v3898_v30 }
 0x5bd   : > { %v1916_v49 = vpop.permute.xlu1 %1915  ;;  %2893 = vmatmul.mubr.msk.f32.gmra.mxu1 %vm293_vm0, %v3900_v53 }
 0x5be   : > { %2911 = vmatprep.mubr.msk.f32.mxu1 %vm495_vm1, %v1687_v36  ;;  %2925 = vmatprep.subr.mxu0 %v1916_v49 }
 0x5bf   : > { %2926 = vmatpush3.msra.mxu0 %v1916_v49 }
 0x5c1   : > { %v1914_v56 = vpop.permute.xlu1 %1913  ;;  %2912 = vmatmul.mubr.msk.f32.vlgmr.msra.gmra.mxu1 %vm495_vm1, %v1689_v15 }
 0x5c2   : > { %2914 = vmatprep.mubr.msk.f32.mxu1 %vm495_vm1, %v1691_v10  ;;  %2927 = vmatprep.subr.mxu0 %v1914_v56 }
 0x5c3   : > { %2928 = vmatpush3.msra.mxu0 %v1914_v56 }
 0x5c5   : > { %v1912_v41 = vpop.permute.xlu1 %1911  ;;  %2915 = vmatmul.mubr.msk.f32.gmra.mxu1 %vm495_vm1, %v1693_v22 }
 0x5c6   : > { %2917 = vmatprep.mubr.msk.f32.mxu1 %vm495_vm1, %v1695_v20  ;;  %2929 = vmatprep.subr.mxu0 %v1912_v41 }
 0x5c7   : > { %2930 = vmatpush3.msra.mxu0 %v1912_v41 }
 0x5c8   : > { %2931 = vmatprep.subr.mxu0 %v1910_v5 }
 0x5c9   : > { %v1908_v50 = vpop.permute.xlu1 %1907  ;;  %2918 = vmatmul.mubr.msk.f32.gmra.mxu1 %vm495_vm1, %v1697_v23  ;;  %2932 = vmatpush3.msra.mxu0 %v1910_v5 }
 0x5ca   : > { %2920 = vmatprep.mubr.msk.f32.mxu1 %vm495_vm1, %v1699_v16  ;;  %2933 = vmatprep.subr.mxu0 %v1908_v50 }
 0x5cb   : > { %2934 = vmatpush3.msra.mxu0 %v1908_v50 }
 0x5cd   : > { %2921 = vmatmul.mubr.msk.f32.gmra.mxu1 %vm495_vm1, %v1701_v59 }
 0x611   : > { %v3914_v54 = vpop.f32.mrf.mxu1 }
 0x613   : > { %v3916_v57 = vpop.f32.mrf.mxu1 }
 0x645   : > { %v3918_v44 = vpop.f32.mrf.mxu1 }
 0x647   : > { %v3920_v46 = vpop.f32.mrf.mxu1 }
 0x649   : > { %v3922_v2 = vpop.f32.mrf.mxu1 }
 0x64b   : > { %v3924_v36 = vpop.f32.mrf.mxu1 }
 0x67d   : > { %v3926_v10 = vpop.f32.mrf.mxu1 }
 0x67f   : > { %v3928_v20 = vpop.f32.mrf.mxu1 }
 0x681   : > { %v3930_v16 = vpop.f32.mrf.mxu1 }
 0x682   : > { %v1858_v60 = vsel %vm293_vm0, %v3930_v16, -inf }
 0x683   : > { %1859 = vmax.xlane.f32.xlu1 %v1858_v60  ;;  %v3934_v52 = vpop.f32.mrf.mxu1  ;;  %v3139_v60 = vld [vmem:[#allocation2 + $0x8] sm:$0xff] }
 0x684   : > { %v1855_v32 = vsel %vm293_vm0, %v3934_v52, -inf }
 0x685   : > { %1856 = vmax.xlane.f32.xlu0 %v1855_v32  ;;  %v3938_v12 = vpop.f32.mrf.mxu1  ;;  %v3140_v32 = vld [vmem:[#allocation2 + $0x18] sm:$0xff] }
 0x686   : > { %v1864_v14 = vsel %vm293_vm0, %v3938_v12, -inf }
 0x687   : > { %v3940_v13 = vpop.f32.mrf.mxu1 }
 0x688   : > { %v1861_v59 = vsel %vm293_vm0, %v3940_v13, -inf }
 0x689   : > { %1865 = vmax.xlane.f32.xlu0 %v1864_v14  ;;  %v3944_v15 = vpop.f32.mrf.mxu1  ;;  %v1239_v14 = vsel %vm293_vm0, %v3684_v33, 0.0  ;;  %v1251_v33 = vsel %vm293_vm0, %v3732_v28, 0.0  ;;  %v1652_v28 = vsel %vm293_vm0, %v3879_v47, 0.0  ;;  %v1664_v47 = vsel %vm293_vm0, %v3898_v30, 0.0 }
 0x68a   : > { %v1870_v22 = vsel %vm293_vm0, %v3944_v15, -inf }
 0x68b   : > { %1871 = vmax.xlane.f32.xlu1 %v1870_v22  ;;  %v3948_v23 = vpop.f32.mrf.mxu1  ;;  %v1245_v22 = vsel %vm293_vm0, %v3723_v26, 0.0  ;;  %v1649_v26 = vsel %vm293_vm0, %v3854_v21, 0.0  ;;  %v1667_v21 = vsel %vm293_vm0, %v3900_v53, 0.0 }
 0x68c   : > { %v1867_v41 = vsel %vm293_vm0, %v3948_v23, -inf }
 0x68d   : > { %1862 = vmax.xlane.f32.xlu0 %v1861_v59  ;;  %v3952_v49 = vpop.f32.mrf.mxu1  ;;  %v1236_v59 = vsel %vm293_vm0, %v3682_v34, 0.0  ;;  %v1661_v34 = vsel %vm293_vm0, %v3892_v11, 0.0  ;;  %v1248_v11 = vsel %vm293_vm0, %v3728_v40, 0.0 }
 0x68e   : > { %v1876_v56 = vsel %vm293_vm0, %v3952_v49, -inf }
 0x68f   : > { %1877 = vmax.xlane.f32.xlu1 %v1876_v56  ;;  %v3958_v5 = vpop.f32.mrf.mxu1  ;;  %v1655_v56 = vsel %vm293_vm0, %v3883_v9, 0.0  ;;  %v1242_v9 = vsel %vm293_vm0, %v3719_v37, 0.0  ;;  %v1658_v37 = vsel %vm293_vm0, %v3888_v6, 0.0 }
 0x690   : > { %v1873_v50 = vsel %vm293_vm0, %v3958_v5, -inf }
 0x691   : > { %1868 = vmax.xlane.f32.xlu0 %v1867_v41  ;;  %v1646_v41 = vsel %vm293_vm0, %v3852_v19, 0.0  ;;  %v1257_v19 = vsel %vm293_vm0, %v3740_v18, 0.0  ;;  %v1254_v18 = vsel %vm293_vm0, %v3738_v58, 0.0 }
 0x695   : > { %1874 = vmax.xlane.f32.xlu0 %v1873_v50 }
 0x6a0   : > { %1903 = vrot.lane.b32.xlu1 %v3139_v60, %s3156_s17 }
 0x6ab   : > { %1905 = vrot.lane.b32.xlu0 %v3140_v32, %s3156_s17 }
 0x6c4   : > { %1240 = vadd.xlane.f32.xlu1 %v1239_v14 }
 0x6c8   : > { %1246 = vadd.xlane.f32.xlu1 %v1245_v22 }
 0x6ca   : > { %1237 = vadd.xlane.f32.xlu0 %v1236_v59 }
 0x6cc   : > { %1656 = vadd.xlane.f32.xlu1 %v1655_v56 }
 0x6ce   : > { %1647 = vadd.xlane.f32.xlu0 %v1646_v41 }
 0x6d0   : > { %1252 = vadd.xlane.f32.xlu1 %v1251_v33 }
 0x6d2   : > { %1650 = vadd.xlane.f32.xlu0 %v1649_v26 }
 0x6d4   : > { %1662 = vadd.xlane.f32.xlu1 %v1661_v34 }
 0x6d6   : > { %1243 = vadd.xlane.f32.xlu0 %v1242_v9 }
 0x6d8   : > { %1258 = vadd.xlane.f32.xlu1 %v1257_v19 }
 0x6da   : > { %1653 = vadd.xlane.f32.xlu0 %v1652_v28 }
 0x6dc   : > { %1668 = vadd.xlane.f32.xlu1 %v1667_v21 }
 0x6de   : > { %1249 = vadd.xlane.f32.xlu0 %v1248_v11 }
 0x6e2   : > { %1659 = vadd.xlane.f32.xlu0 %v1658_v37 }
 0x6e6   : > { %1255 = vadd.xlane.f32.xlu0 %v1254_v18 }
 0x6ea   : > { %1665 = vadd.xlane.f32.xlu0 %v1664_v47 }
 0x70c   : > { %v1860_v50 = vpop.xlane.xlu1 %1859 }
 0x70d   : > { %v1880_v53 = vsub.f32 %v3930_v16, %v1860_v50 }
 0x70e   : > { %v1857_v60 = vpop.xlane.xlu0 %1856 }
 0x70f   : > { %v1889_v32 = vmul.f32 1.442695, %v1880_v53  ;;  %v1879_v40 = vsub.f32 %v3934_v52, %v1857_v60 }
 0x711   : > { %3059 = vpow2.f32 %v1889_v32  ;;  %v1887_v14 = vmul.f32 1.442695, %v1879_v40 }
 0x712   : > { %v1866_v22 = vpop.xlane.xlu0 %1865 }
 0x713   : > { %3061 = vpow2.f32 %v1887_v14  ;;  %v1882_v6 = vsub.f32 %v3938_v12, %v1866_v22 }
 0x714   : > { %v1872_v59 = vpop.xlane.xlu1 %1871 }
 0x715   : > { %v1893_v58 = vmul.f32 1.442695, %v1882_v6  ;;  %v1884_v56 = vsub.f32 %v3944_v15, %v1872_v59 }
 0x716   : > { %v1863_v41 = vpop.xlane.xlu0 %1862 }
 0x717   : > { %3063 = vpow2.f32 %v1893_v58  ;;  %v1897_v30 = vmul.f32 1.442695, %v1884_v56  ;;  %v1881_v33 = vsub.f32 %v3940_v13, %v1863_v41  ;;  %v821_v58 = vsel %vm293_vm0, %v3619_v7, 0.0 }
 0x718   : > { %v1878_v16 = vpop.xlane.xlu1 %1877  ;;  %v827_v41 = vsel %vm293_vm0, %v3635_v17, 0.0  ;;  %v824_v7 = vsel %vm293_vm0, %v3632_v62, 0.0 }
 0x719   : > { %3065 = vpow2.f32 %v1897_v30  ;;  %v1891_v26 = vmul.f32 1.442695, %v1881_v33  ;;  %v1886_v52 = vsub.f32 %v3952_v49, %v1878_v16  ;;  %v818_v30 = vsel %vm293_vm0, %v3615_v35, 0.0 }
 0x71a   : > { %v1869_v34 = vpop.xlane.xlu0 %1868  ;;  %v833_v33 = vsel %vm293_vm0, %v3649_v27, 0.0  ;;  %v839_v16 = vsel %vm293_vm0, %v3665_v29, 0.0  ;;  %v836_v35 = vsel %vm293_vm0, %v3662_v55, 0.0 }
 0x71b   : > { %3067 = vpow2.f32 %v1891_v26  ;;  %v1901_v9 = vmul.f32 1.442695, %v1886_v52  ;;  %v1883_v19 = vsub.f32 %v3948_v23, %v1869_v34  ;;  %v830_v26 = vsel %vm293_vm0, %v3646_v38, 0.0 }
 0x71c   : > { %v1904_v47 = vpop.permute.xlu1 %1903 }
 0x71d   : > { %3069 = vpow2.f32 %v1901_v9  ;;  %v1895_v12 = vmul.f32 1.442695, %v1883_v19 }
 0x71e   : > { %v3060_v28 = vpop.eup %3059  ;;  %v1875_v21 = vpop.xlane.xlu0 %1874 }
 0x71f   : > { %3071 = vpow2.f32 %v1895_v12  ;;  %v1885_v15 = vsub.f32 %v3958_v5, %v1875_v21  ;;  %v2059_v11 = vsel %vm293_vm0, %v3060_v28, 0.0 }
 0x720   : > { %v3062_v13 = vpop.eup %3061  ;;  %2060 = vadd.xlane.f32.xlu1 %v2059_v11 }
 0x721   : > { %v1899_v37 = vmul.f32 1.442695, %v1885_v15  ;;  %2939 = vmatprep.mubr.msk.f32.mxu0 %vm293_vm0, %v3062_v13  ;;  %v2056_v49 = vsel %vm293_vm0, %v3062_v13, 0.0 }
 0x722   : > { %2057 = vadd.xlane.f32.xlu0 %v2056_v49  ;;  %v1906_v18 = vpop.permute.xlu0 %1905 }
 0x723   : > { %3073 = vpow2.f32 %v1899_v37  ;;  %2935 = vmatprep.subr.mxu0 %v1906_v18 }
 0x724   : > { %v3064_v23 = vpop.eup %3063  ;;  %2936 = vmatpush3.msra.mxu0 %v1906_v18 }
 0x725   : > { %2937 = vmatprep.subr.mxu0 %v1904_v47  ;;  %v2065_v50 = vsel %vm293_vm0, %v3064_v23, 0.0 }
 0x726   : > { %v3066_v5 = vpop.eup %3065  ;;  %2066 = vadd.xlane.f32.xlu1 %v2065_v50  ;;  %2938 = vmatpush3.msra.mxu0 %v1904_v47 }
 0x727   : > { %2940 = vmatmul.mubr.msk.f32.vlgmr.msra.gmra.mxu0 %vm293_vm0, %v3060_v28  ;;  %v2071_v60 = vsel %vm293_vm0, %v3066_v5, 0.0 }
 0x728   : > { %v3068_v53 = vpop.eup %3067 }
 0x729   : > { %2942 = vmatprep.mubr.msk.f32.mxu0 %vm293_vm0, %v3068_v53  ;;  %v2062_v32 = vsel %vm293_vm0, %v3068_v53, 0.0 }
 0x72a   : > { %v3070_v40 = vpop.eup %3069  ;;  %2072 = vadd.xlane.f32.xlu1 %v2071_v60  ;;  %2063 = vadd.xlane.f32.xlu0 %v2062_v32 }
 0x72b   : > { %2943 = vmatmul.mubr.msk.f32.gmra.mxu0 %vm293_vm0, %v3064_v23  ;;  %v2077_v22 = vsel %vm293_vm0, %v3070_v40, 0.0 }
 0x72c   : > { %v3072_v14 = vpop.eup %3071 }
 0x72d   : > { %2945 = vmatprep.mubr.msk.f32.mxu0 %vm293_vm0, %v3072_v14  ;;  %v2068_v6 = vsel %vm293_vm0, %v3072_v14, 0.0 }
 0x72e   : > { %2078 = vadd.xlane.f32.xlu1 %v2077_v22  ;;  %2069 = vadd.xlane.f32.xlu0 %v2068_v6 }
 0x72f   : > { %2946 = vmatmul.mubr.msk.f32.gmra.mxu0 %vm293_vm0, %v3066_v5 }
 0x730   : > { %v3074_v59 = vpop.eup %3073 }
 0x731   : > { %2948 = vmatprep.mubr.msk.f32.mxu0 %vm293_vm0, %v3074_v59  ;;  %v2074_v56 = vsel %vm293_vm0, %v3074_v59, 0.0 }
 0x732   : > { %822 = vadd.xlane.f32.xlu1 %v821_v58  ;;  %2075 = vadd.xlane.f32.xlu0 %v2074_v56 }
 0x733   : > { %2949 = vmatmul.mubr.msk.f32.gmra.mxu0 %vm293_vm0, %v3070_v40 }
 0x736   : > { %828 = vadd.xlane.f32.xlu1 %v827_v41  ;;  %819 = vadd.xlane.f32.xlu0 %v818_v30  ;;  %v2223_v41 = vld [vmem:[%s4162_s3 + $0x28] sm:$0xff] }
 0x73a   : > { %834 = vadd.xlane.f32.xlu1 %v833_v33  ;;  %825 = vadd.xlane.f32.xlu0 %v824_v7  ;;  %v2222_v33 = vld [vmem:[%s4162_s3 + $0x20] sm:$0xff] }
 0x73e   : > { %840 = vadd.xlane.f32.xlu1 %v839_v16  ;;  %831 = vadd.xlane.f32.xlu0 %v830_v26  ;;  %v2221_v16 = vld [vmem:[%s4162_s3 + $0x18] sm:$0xff] }
 0x742   : > { %837 = vadd.xlane.f32.xlu0 %v836_v35  ;;  %v2220_v35 = vld [vmem:[%s4162_s3 + $0x10] sm:$0xff] }
 0x74d   : > { %v1241_v17 = vpop.xlane.xlu1 %1240 }
 0x74e   : > { %3075 = vrcp.f32 %v1241_v17 }
 0x751   : > { %v1247_v27 = vpop.xlane.xlu1 %1246 }
 0x753   : > { %v1238_v52 = vpop.xlane.xlu0 %1237 }
 0x754   : > { %3077 = vrcp.f32 %v1238_v52 }
 0x755   : > { %v1657_v62 = vpop.xlane.xlu1 %1656 }
 0x757   : > { %v1648_v34 = vpop.xlane.xlu0 %1647 }
 0x758   : > { %3079 = vrcp.f32 %v1648_v34 }
 0x759   : > { %v1253_v38 = vpop.xlane.xlu1 %1252 }
 0x75b   : > { %v3076_v9 = vpop.eup %3075  ;;  %v1651_v19 = vpop.xlane.xlu0 %1650 }
 0x75c   : > { %3081 = vrcp.f32 %v1651_v19  ;;  %v1269_v29 = vmul.f32 %v3076_v9, %v3774_v43  ;;  %v2218_v9 = vld [vmem:[%s4162_s3] sm:$0xff] }
 0x75d   : > { %3083 = vrcp.f32 %v1247_v27  ;;  %v1663_v21 = vpop.xlane.xlu1 %1662 }
 0x75e   : > { %2106 = vrot.lane.b32.xlu1 %v1269_v29, %s3155_s16 }
 0x75f   : > { %v1244_v12 = vpop.xlane.xlu0 %1243 }
 0x760   : > { %3085 = vrcp.f32 %v1244_v12 }
 0x761   : > { %v3078_v55 = vpop.eup %3077  ;;  %3087 = vrcp.f32 %v1657_v62  ;;  %v1259_v49 = vpop.xlane.xlu1 %1258  ;;  %v2219_v62 = vld [vmem:[%s4162_s3 + $0x8] sm:$0xff] }
 0x762   : > { %v1268_v28 = vmul.f32 %v3078_v55, %v3776_v0 }
 0x763   : > { %v1654_v15 = vpop.xlane.xlu0 %1653 }
 0x764   : > { %3089 = vrcp.f32 %v1654_v15  ;;  %2104 = vrot.lane.b32.xlu0 %v1268_v28, %s3155_s16 }
 0x765   : > { %v3080_v11 = vpop.eup %3079  ;;  %3091 = vrcp.f32 %v1253_v38  ;;  %v1669_v53 = vpop.xlane.xlu1 %1668 }
 0x766   : > { %v1678_v13 = vmul.f32 %v3080_v11, %v3916_v57 }
 0x767   : > { %v1250_v43 = vpop.xlane.xlu0 %1249 }
 0x768   : > { %3093 = vrcp.f32 %v1250_v43  ;;  %2136 = vrot.lane.b32.xlu1 %v1678_v13, %s3153_s14 }
 0x769   : > { %v3082_v37 = vpop.eup %3081  ;;  %3095 = vrcp.f32 %v1663_v21 }
 0x76a   : > { %v1679_v18 = vmul.f32 %v3082_v37, %v3914_v54  ;;  %v3084_v23 = vpop.eup %3083 }
 0x76b   : > { %v1660_v0 = vpop.xlane.xlu0 %1659  ;;  %v1271_v50 = vmul.f32 %v3084_v23, %v3778_v1 }
 0x76c   : > { %3097 = vrcp.f32 %v1660_v0  ;;  %2138 = vrot.lane.b32.xlu1 %v1679_v18, %s3153_s14 }
 0x76d   : > { %v3086_v47 = vpop.eup %3085  ;;  %3099 = vrcp.f32 %v1259_v49 }
 0x76e   : > { %v1270_v57 = vmul.f32 %v3086_v47, %v3780_v31  ;;  %v3088_v5 = vpop.eup %3087 }
 0x76f   : > { %v1256_v60 = vpop.xlane.xlu0 %1255  ;;  %v1681_v32 = vmul.f32 %v3088_v5, %v3918_v44  ;;  %v2225_v44 = vld [vmem:[%s4162_s3 + $0x38] sm:$0xff] }
 0x770   : > { %3101 = vrcp.f32 %v1256_v60  ;;  %2110 = vrot.lane.b32.xlu1 %v1271_v50, %s3155_s16  ;;  %2108 = vrot.lane.b32.xlu0 %v1270_v57, %s3155_s16 }
 0x771   : > { %v3090_v54 = vpop.eup %3089  ;;  %3103 = vrcp.f32 %v1669_v53  ;;  %2951 = vmatprep.subr.mxu0 %v2225_v44  ;;  %2979 = vmatprep.subr.mxu1 %v2225_v44 }
 0x772   : > { %v1680_v40 = vmul.f32 %v3090_v54, %v3920_v46  ;;  %v3092_v14 = vpop.eup %3091  ;;  %v2224_v46 = vld [vmem:[%s4162_s3 + $0x30] sm:$0xff]  ;;  %2952 = vmatpush3.msra.mxu0 %v2225_v44  ;;  %2987 = vmatpush3.msra.mxu1 %v2225_v44 }
 0x773   : > { %v1666_v22 = vpop.xlane.xlu0 %1665  ;;  %v1273_v31 = vmul.f32 %v3092_v14, %v3782_v4  ;;  %2953 = vmatprep.subr.mxu0 %v2224_v46  ;;  %2980 = vmatprep.subr.mxu1 %v2224_v46 }
 0x774   : > { %3105 = vrcp.f32 %v1666_v22  ;;  %2142 = vrot.lane.b32.xlu1 %v1681_v32, %s3153_s14  ;;  %2140 = vrot.lane.b32.xlu0 %v1680_v40, %s3153_s14 }
 0x775   : > { %v3094_v1 = vpop.eup %3093  ;;  %2954 = vmatpush3.msra.mxu0 %v2224_v46  ;;  %2988 = vmatpush3.msra.mxu1 %v2224_v46 }
 0x776   : > { %v1272_v6 = vmul.f32 %v3094_v1, %v3784_v42  ;;  %v3096_v59 = vpop.eup %3095  ;;  %2955 = vmatprep.subr.mxu0 %v2223_v41  ;;  %2981 = vmatprep.subr.mxu1 %v2223_v41 }
 0x777   : > { %v1683_v4 = vmul.f32 %v3096_v59, %v3922_v2  ;;  %2956 = vmatpush3.msra.mxu0 %v2223_v41  ;;  %2989 = vmatpush3.msra.mxu1 %v2223_v41 }
 0x778   : > { %2114 = vrot.lane.b32.xlu1 %v1273_v31, %s3155_s16  ;;  %2112 = vrot.lane.b32.xlu0 %v1272_v6, %s3155_s16 }
 0x779   : > { %v3098_v58 = vpop.eup %3097  ;;  %2957 = vmatprep.subr.mxu0 %v2222_v33  ;;  %2982 = vmatprep.subr.mxu1 %v2222_v33 }
 0x77a   : > { %v1682_v42 = vmul.f32 %v3098_v58, %v3924_v36  ;;  %v3100_v56 = vpop.eup %3099  ;;  %2958 = vmatpush3.msra.mxu0 %v2222_v33  ;;  %2990 = vmatpush3.msra.mxu1 %v2222_v33 }
 0x77b   : > { %v1275_v2 = vmul.f32 %v3100_v56, %v3786_v45  ;;  %2959 = vmatprep.subr.mxu0 %v2221_v16  ;;  %2983 = vmatprep.subr.mxu1 %v2221_v16 }
 0x77c   : > { %2146 = vrot.lane.b32.xlu1 %v1683_v4, %s3153_s14  ;;  %2144 = vrot.lane.b32.xlu0 %v1682_v42, %s3153_s14 }
 0x77d   : > { %v3102_v30 = vpop.eup %3101  ;;  %2960 = vmatpush3.msra.mxu0 %v2221_v16  ;;  %2991 = vmatpush3.msra.mxu1 %v2221_v16 }
 0x77e   : > { %v1274_v36 = vmul.f32 %v3102_v30, %v3788_v24  ;;  %v3104_v7 = vpop.eup %3103  ;;  %2961 = vmatprep.subr.mxu0 %v2220_v35  ;;  %2984 = vmatprep.subr.mxu1 %v2220_v35 }
 0x77f   : > { %v1685_v24 = vmul.f32 %v3104_v7, %v3926_v10  ;;  %2962 = vmatpush3.msra.mxu0 %v2220_v35  ;;  %2992 = vmatpush3.msra.mxu1 %v2220_v35 }
 0x780   : > { %2118 = vrot.lane.b32.xlu1 %v1275_v2, %s3155_s16  ;;  %2116 = vrot.lane.b32.xlu0 %v1274_v36, %s3155_s16  ;;  %s224_s16 = scalar_lea.vmem %s4164_s5, %s2581_s7 }
 0x781   : > { %v3106_v45 = vpop.eup %3105  ;;  %2963 = vmatprep.subr.mxu0 %v2219_v62  ;;  %2985 = vmatprep.subr.mxu1 %v2219_v62 }
 0x782   : > { %v1684_v26 = vmul.f32 %v3106_v45, %v3928_v20  ;;  %2964 = vmatpush3.msra.mxu0 %v2219_v62  ;;  %2993 = vmatpush3.msra.mxu1 %v2219_v62 }
 0x783   : > { %2965 = vmatprep.subr.mxu0 %v2218_v9  ;;  %2986 = vmatprep.subr.mxu1 %v2218_v9 }
 0x784   : > { %2150 = vrot.lane.b32.xlu1 %v1685_v24, %s3153_s14  ;;  %2148 = vrot.lane.b32.xlu0 %v1684_v26, %s3153_s14 }
 0x785   : > { %2966 = vmatpush3.msra.mxu0 %v2218_v9  ;;  %2994 = vmatpush3.msra.mxu1 %v2218_v9 }
 0x7a9   : > { %v2061_v10 = vpop.xlane.xlu1 %2060 }
 0x7aa   : > { %3107 = vrcp.f32 %v2061_v10 }
 0x7ab   : > { %v2058_v20 = vpop.xlane.xlu0 %2057 }
 0x7ac   : > { %3109 = vrcp.f32 %v2058_v20 }
 0x7af   : > { %v2067_v17 = vpop.xlane.xlu1 %2066 }
 0x7b0   : > { %3111 = vrcp.f32 %v2067_v17 }
 0x7b3   : > { %v2064_v27 = vpop.xlane.xlu0 %2063  ;;  %v2073_v52 = vpop.xlane.xlu1 %2072 }
 0x7b4   : > { %3113 = vrcp.f32 %v2064_v27 }
 0x7b5   : > { %3115 = vrcp.f32 %v2073_v52 }
 0x7b7   : > { %v2070_v34 = vpop.xlane.xlu0 %2069  ;;  %v2079_v19 = vpop.xlane.xlu1 %2078 }
 0x7b8   : > { %3117 = vrcp.f32 %v2070_v34  ;;  %v3108_v38 = vpop.eup %3107 }
 0x7b9   : > { %3119 = vrcp.f32 %v2079_v19  ;;  %v3110_v28 = vpop.eup %3109 }
 0x7bb   : > { %v2076_v29 = vpop.xlane.xlu0 %2075  ;;  %v823_v22 = vpop.xlane.xlu1 %822 }
 0x7bc   : > { %3121 = vrcp.f32 %v2076_v29 }
 0x7bd   : > { %v3112_v11 = vpop.eup %3111 }
 0x7bf   : > { %v829_v1 = vpop.xlane.xlu1 %828  ;;  %v820_v6 = vpop.xlane.xlu0 %819 }
 0x7c0   : > { %3123 = vrcp.f32 %v820_v6 }
 0x7c1   : > { %v3114_v37 = vpop.eup %3113  ;;  %3125 = vrcp.f32 %v823_v22 }
 0x7c2   : > { %v3116_v23 = vpop.eup %3115 }
 0x7c3   : > { %v835_v31 = vpop.xlane.xlu1 %834  ;;  %v826_v44 = vpop.xlane.xlu0 %825 }
 0x7c4   : > { %3127 = vrcp.f32 %v826_v44 }
 0x7c5   : > { %v3118_v50 = vpop.eup %3117  ;;  %3129 = vrcp.f32 %v829_v1 }
 0x7c6   : > { %v3120_v53 = vpop.eup %3119 }
 0x7c7   : > { %v841_v59 = vpop.xlane.xlu1 %840  ;;  %v832_v58 = vpop.xlane.xlu0 %831 }
 0x7c8   : > { %3131 = vrcp.f32 %v832_v58 }
 0x7c9   : > { %v3122_v32 = vpop.eup %3121  ;;  %3133 = vrcp.f32 %v835_v31 }
 0x7cb   : > { %v838_v42 = vpop.xlane.xlu0 %837 }
 0x7cc   : > { %3135 = vrcp.f32 %v838_v42  ;;  %v2570_v42 = vld [vmem:[%s4163_s4] ss:$0 sm:$0xff] }
 0x7cd   : > { %v3124_v10 = vpop.eup %3123  ;;  %3137 = vrcp.f32 %v841_v59 }
 0x7ce   : > { %v3126_v17 = vpop.eup %3125  ;;  %v850_v52 = vmul.f32 %v3124_v10, %v3760_v61 }
 0x7cf   : > { %v851_v34 = vmul.f32 %v3126_v17, %v3758_v63 }
 0x7d0   : > { %v2107_v46 = vpop.permute.xlu1 %2106 }
 0x7d1   : > { %v3128_v62 = vpop.eup %3127 }
 0x7d2   : > { %v3130_v19 = vpop.eup %3129 }
 0x7d6   : > { %v2105_v41 = vpop.permute.xlu0 %2104 }
 0x7d7   : > { %v2192_v29 = vsel %vm495_vm1, %v850_v52, %v2105_v41 }
 0x7da   : > { %v2137_v4 = vpop.permute.xlu1 %2136 }
 0x7de   : > { %v2139_v56 = vpop.permute.xlu1 %2138 }
 0x7e2   : > { %v2111_v30 = vpop.permute.xlu1 %2110  ;;  %v2109_v2 = vpop.permute.xlu0 %2108 }
 0x7e6   : > { %v2143_v36 = vpop.permute.xlu1 %2142  ;;  %v2141_v33 = vpop.permute.xlu0 %2140 }
 0x7e7   : > { %v2941_v12 = vpop.f32.mrf.mxu0 }
 0x7e8   : > { %v2089_v55 = vmul.f32 %v3108_v38, %v2941_v12  ;;  %v2193_v38 = vsel %vm495_vm1, %v851_v34, %v2107_v46  ;;  %v2201_v12 = vsel %vm2200_vm2, %v2192_v29, %v2137_v4 }
 0x7e9   : > { %v2017_v21 = vpop.f32.mrf.mxu0 }
 0x7ea   : > { %v2088_v15 = vmul.f32 %v3110_v28, %v2017_v21  ;;  %2170 = vrot.lane.b32.xlu1 %v2089_v55, %s3150_s11  ;;  %v2115_v7 = vpop.permute.xlu1 %2114  ;;  %v2113_v16 = vpop.permute.xlu0 %2112  ;;  %v2202_v28 = vsel %vm2200_vm2, %v2193_v38, %v2139_v56  ;;  %v852_v21 = vmul.f32 %v3128_v62, %v3764_v51 }
 0x7eb   : > { %v2944_v13 = vpop.f32.mrf.mxu0 }
 0x7ec   : > { %v2091_v43 = vmul.f32 %v3112_v11, %v2944_v13  ;;  %2168 = vrot.lane.b32.xlu0 %v2088_v15, %s3150_s11  ;;  %v3132_v15 = vpop.eup %3131  ;;  %v853_v11 = vmul.f32 %v3130_v19, %v3762_v48 }
 0x7ed   : > { %v2027_v49 = vpop.f32.mrf.mxu0 }
 0x7ee   : > { %v2090_v18 = vmul.f32 %v3114_v37, %v2027_v49  ;;  %2174 = vrot.lane.b32.xlu1 %v2091_v43, %s3150_s11  ;;  %v2147_v45 = vpop.permute.xlu1 %2146  ;;  %v2145_v24 = vpop.permute.xlu0 %2144  ;;  %v2194_v37 = vsel %vm495_vm1, %v852_v21, %v2109_v2  ;;  %v2195_v49 = vsel %vm495_vm1, %v853_v11, %v2111_v30 }
 0x7ef   : > { %v2947_v0 = vpop.f32.mrf.mxu0  ;;  %v3134_v43 = vpop.eup %3133 }
 0x7f0   : > { %v2093_v47 = vmul.f32 %v3116_v23, %v2947_v0  ;;  %2172 = vrot.lane.b32.xlu0 %v2090_v18, %s3150_s11  ;;  %v2203_v18 = vsel %vm2200_vm2, %v2194_v37, %v2141_v33  ;;  %v2204_v23 = vsel %vm2200_vm2, %v2195_v49, %v2143_v36  ;;  %v854_v0 = vmul.f32 %v3132_v15, %v3768_v8 }
 0x7f1   : > { %v2037_v57 = vpop.f32.mrf.mxu0 }
 0x7f2   : > { %v2092_v5 = vmul.f32 %v3118_v50, %v2037_v57  ;;  %2178 = vrot.lane.b32.xlu1 %v2093_v47, %s3150_s11  ;;  %v2119_v26 = vpop.permute.xlu1 %2118  ;;  %v2117_v35 = vpop.permute.xlu0 %2116  ;;  %v855_v50 = vmul.f32 %v3134_v43, %v3766_v3 }
 0x7f3   : > { %v2950_v60 = vpop.f32.mrf.mxu0  ;;  %v3136_v47 = vpop.eup %3135 }
 0x7f4   : > { %v2095_v54 = vmul.f32 %v3120_v53, %v2950_v60  ;;  %2176 = vrot.lane.b32.xlu0 %v2092_v5, %s3150_s11  ;;  %v3138_v53 = vpop.eup %3137  ;;  %v2196_v60 = vsel %vm495_vm1, %v854_v0, %v2113_v16 }
 0x7f5   : > { %v2047_v40 = vpop.f32.mrf.mxu0  ;;  %v857_v22 = vmul.f32 %v3138_v53, %v3770_v25 }
 0x7f6   : > { %v2094_v14 = vmul.f32 %v3122_v32, %v2047_v40  ;;  %2182 = vrot.lane.b32.xlu1 %v2095_v54, %s3150_s11  ;;  %v2151_v20 = vpop.permute.xlu1 %2150  ;;  %v2149_v27 = vpop.permute.xlu0 %2148  ;;  %v2197_v54 = vsel %vm495_vm1, %v855_v50, %v2115_v7  ;;  %v2205_v32 = vsel %vm2200_vm2, %v2196_v60, %v2145_v24 }
 0x7f7   : > { %v2206_v40 = vsel %vm2200_vm2, %v2197_v54, %v2147_v45  ;;  %v2199_v59 = vsel %vm495_vm1, %v857_v22, %v2119_v26 }
 0x7f8   : > { %2180 = vrot.lane.b32.xlu0 %v2094_v14, %s3150_s11  ;;  %v856_v14 = vmul.f32 %v3136_v47, %v3772_v39  ;;  %v2208_v39 = vsel %vm2200_vm2, %v2199_v59, %v2151_v20 }
 0x7fa   : > { %v2198_v31 = vsel %vm495_vm1, %v856_v14, %v2117_v35 }
 0x7fb   : > { %v2207_v44 = vsel %vm2200_vm2, %v2198_v31, %v2149_v27 }
 0x85c   : > { %v2171_v9 = vpop.permute.xlu1 %2170 }
 0x85d   : > { %v2211_v63 = vsel %vm2209_vm3, %v2202_v28, %v2171_v9 }
 0x85e   : > { %v2169_v55 = vpop.permute.xlu0 %2168 }
 0x85f   : > { %v2210_v61 = vsel %vm2209_vm3, %v2201_v12, %v2169_v55 }
 0x860   : > { %v2175_v13 = vpop.permute.xlu1 %2174  ;;  %2967 = vmatprep.mubr.msk.f32.mxu0 %vm293_vm0, %v2210_v61 }
 0x861   : > { %2968 = vmatmul.mubr.msk.f32.vlgmr.msra.gmra.mxu0 %vm293_vm0, %v2211_v63  ;;  %v2213_v57 = vsel %vm2209_vm3, %v2204_v23, %v2175_v13 }
 0x862   : > { %v2173_v51 = vpop.permute.xlu0 %2172 }
 0x863   : > { %v2212_v48 = vsel %vm2209_vm3, %v2203_v18, %v2173_v51 }
 0x864   : > { %v2179_v5 = vpop.permute.xlu1 %2178  ;;  %2970 = vmatprep.mubr.msk.f32.mxu0 %vm293_vm0, %v2212_v48 }
 0x865   : > { %2971 = vmatmul.mubr.msk.f32.gmra.mxu0 %vm293_vm0, %v2213_v57  ;;  %v2215_v1 = vsel %vm2209_vm3, %v2206_v40, %v2179_v5 }
 0x866   : > { %v2177_v8 = vpop.permute.xlu0 %2176 }
 0x867   : > { %v2214_v3 = vsel %vm2209_vm3, %v2205_v32, %v2177_v8 }
 0x868   : > { %2973 = vmatprep.mubr.msk.f32.mxu1 %vm293_vm0, %v2214_v3  ;;  %v2183_v6 = vpop.permute.xlu1 %2182 }
 0x869   : > { %2974 = vmatmul.mubr.msk.f32.vlgmr.msra.gmra.mxu1 %vm293_vm0, %v2215_v1  ;;  %v2217_v25 = vsel %vm2209_vm3, %v2208_v39, %v2183_v6 }
 0x86a   : > { %v2181_v46 = vpop.permute.xlu0 %2180 }
 0x86b   : > { %v2216_v58 = vsel %vm2209_vm3, %v2207_v44, %v2181_v46 }
 0x86c   : > { %2976 = vmatprep.mubr.msk.f32.mxu1 %vm293_vm0, %v2216_v58 }
 0x86d   : > { %2977 = vmatmul.mubr.msk.f32.gmra.mxu1 %vm293_vm0, %v2217_v25 }
 0x921   : > { %v2969_v4 = vpop.f32.mrf.mxu0 }
 0x922   : > { %v2329_v2 = vadd.f32 %v2969_v4, %v2570_v42 }
 0x923   : > { %v2323_v56 = vpop.f32.mrf.mxu0 }
 0x924   : > { %v2324_v41 = vadd.f32 %v2570_v42, %v2323_v56 }
 0x925   : > { %v2972_v30 = vpop.f32.mrf.mxu0 }
 0x926   : > { %2362 = vxpose.xlu0.b32.start [1/8] (short) (narrow) %v2324_v41, 64  ;;  %v2339_v16 = vadd.f32 %v2972_v30, %v2570_v42 }
 0x927   : > { %v2333_v36 = vpop.f32.mrf.mxu0 }
 0x928   : > { %v2334_v33 = vadd.f32 %v2570_v42, %v2333_v36 }
 0x929   : > { %v2975_v7 = vpop.f32.mrf.mxu1 }
 0x92a   : > { %2363 = vxpose.xlu0.b32.cont [2/8] (short) (narrow) %v2329_v2, 64  ;;  %v2349_v35 = vadd.f32 %v2975_v7, %v2570_v42 }
 0x92b   : > { %v2343_v45 = vpop.f32.mrf.mxu1 }
 0x92c   : > { %v2344_v24 = vadd.f32 %v2570_v42, %v2343_v45 }
 0x92d   : > { %v2978_v26 = vpop.f32.mrf.mxu1 }
 0x92e   : > { %2364 = vxpose.xlu0.b32.cont [3/8] (short) (narrow) %v2334_v33, 64  ;;  %v2359_v17 = vadd.f32 %v2978_v26, %v2570_v42 }
 0x92f   : > { %v2353_v10 = vpop.f32.mrf.mxu1 }
 0x930   : > { %v2354_v20 = vadd.f32 %v2570_v42, %v2353_v10 }
 0x932   : > { %2365 = vxpose.xlu0.b32.cont [4/8] (short) (narrow) %v2339_v16, 64 }
 0x936   : > { %2366 = vxpose.xlu0.b32.cont [5/8] (short) (narrow) %v2344_v24, 64 }
 0x93a   : > { %2367 = vxpose.xlu0.b32.cont [6/8] (short) (narrow) %v2349_v35, 64 }
 0x93e   : > { %2368 = vxpose.xlu0.b32.cont [7/8] (short) (narrow) %v2354_v20, 64 }
 0x942   : > { %2369 = vxpose.xlu0.b32.end [8/8] (short) (narrow) %v2359_v17, 64 }
 0x9a2   : > { %v2378_v27 = vpop.trf.xlu0 }
 0x9a3   : > { %2394 = vst.msk [vmem:[%s224_s16] sm:$0xff] %vm293_vm0, %v2378_v27 }
 0x9a6   : > { %v2379_v52 = vpop.trf.xlu0 }
 0x9a7   : > { %2395 = vst.msk [vmem:[%s224_s16 + $0x8] sm:$0xff] %vm293_vm0, %v2379_v52 }
 0x9aa   : > { %v2380_v62 = vpop.trf.xlu0 }
 0x9ab   : > { %2396 = vst.msk [vmem:[%s224_s16 + $0x10] sm:$0xff] %vm293_vm0, %v2380_v62 }
 0x9ae   : > { %v2381_v34 = vpop.trf.xlu0 }
 0x9af   : > { %2397 = vst.msk [vmem:[%s224_s16 + $0x18] sm:$0xff] %vm293_vm0, %v2381_v34 }
 0x9b2   : > { %v2382_v9 = vpop.trf.xlu0 }
 0x9b3   : > { %2398 = vst.msk [vmem:[%s224_s16 + $0x20] sm:$0xff] %vm293_vm0, %v2382_v9 }
 0x9b6   : > { %v2383_v19 = vpop.trf.xlu0 }
 0x9b7   : > { %2399 = vst.msk [vmem:[%s224_s16 + $0x28] sm:$0xff] %vm293_vm0, %v2383_v19 }
 0x9ba   : > { %v2384_v29 = vpop.trf.xlu0 }
 0x9bb   : > { %2400 = vst.msk [vmem:[%s224_s16 + $0x30] sm:$0xff] %vm293_vm0, %v2384_v29 }
 0x9be   : > { %v2385_v38 = vpop.trf.xlu0 }
 0x9bf   : > { %2401 = vst.msk [vmem:[%s224_s16 + $0x38] sm:$0xff] %vm293_vm0, %v2385_v38 }
 0x9c0 PF: > { %s15_s18 = sadd.s32 1, %s3147_s18  }
 0x9c1   : > { %p12_p4 = scmp.ge.s32.totalorder %s15_s18, 4  }
 0x9c3   :  { %14 = sbr.rel (!%p12_p4) target bundleno = 1 (0x1), region = 70 }

</bundles_post_ra>
